<compile_context>
chip_gen: v7x
topology: tpu7x:2x2x1
jax: 0.10.0
libtpu: 0.0.40
codegen_flags: <defaults>
</compile_context>

<pallas_src>
import functools

import jax
import jax.numpy as jnp
from jax.experimental import pallas as pl
from jax.experimental.pallas import tpu as pltpu

COMPUTE_DTYPE = jnp.bfloat16


# ----------------------------------------------------------------------------
# Fused kernel:  concat(x2, x1) -> conv3x3+ReLU -> conv3x3+ReLU
# Layout inside the kernel: channels on sublanes, flattened H*W on lanes.
# ----------------------------------------------------------------------------
def _double_conv_kernel(xa_ref, xb_ref, w1_ref, b1_ref, w2_ref, b2_ref,
                        mask_ref, o_ref, *, H, W, Cout, PAD):
    HW = H * W
    mask_l = mask_ref[0:1, :]  # (1, HW): 0 where w == 0      (for dx = -1 taps)
    mask_r = mask_ref[1:2, :]  # (1, HW): 0 where w == W - 1  (for dx = +1 taps)

    def taps(xp):
        # xp: (C, L) flattened image with PAD zeros on both lane ends.
        # Returns the im2col patch (9*C, HW); rows ordered (ky, kx, c) to match
        # the (Cout, 9*C) weight matrix built in the wrapper.
        pieces = []
        for dy in (-1, 0, 1):
            for dx in (-1, 0, 1):
                start = PAD + dy * W + dx          # static lane offset
                t = xp[:, start:start + HW]        # (C, HW) lane-shifted view
                if dx == -1:
                    t = t * mask_l                 # kill row-wrap at w == 0
                elif dx == 1:
                    t = t * mask_r                 # kill row-wrap at w == W-1
                pieces.append(t)
        return jnp.concatenate(pieces, axis=0)     # (9*C, HW)

    # ---- conv1: fused channel concat [x2, x1], one K = 9*Cin matmul --------
    x0 = jnp.concatenate([xa_ref[...], xb_ref[...]], axis=0)     # (Cin, L)
    p1 = taps(x0)                                                # (9*Cin, HW)
    acc1 = jnp.dot(w1_ref[...], p1,
                   preferred_element_type=jnp.float32)           # (Cout, HW) f32
    h = jnp.maximum(acc1 + b1_ref[...], 0.0)                     # bias + ReLU

    # ---- conv2: intermediate stays in VMEM (re-padded along lanes) ---------
    zpad = jnp.zeros((Cout, PAD), dtype=x0.dtype)
    hpad = jnp.concatenate([zpad, h.astype(x0.dtype), zpad], axis=1)  # (Cout, L)
    p2 = taps(hpad)                                              # (9*Cout, HW)
    acc2 = jnp.dot(w2_ref[...], p2,
                   preferred_element_type=jnp.float32)           # (Cout, HW)
    out = jnp.maximum(acc2 + b2_ref[...], 0.0)

    # Lane-dense store; layout is already flattened NCHW.
    o_ref[...] = out.astype(o_ref.dtype)


def double_conv_up(x2, x1u, params):
    """x2: (N, C2, H, W), x1u: (N, C1, H, W) NCHW. Returns (N, Cout, H, W)."""
    N, C2, H, W = x2.shape
    _, C1, _, _ = x1u.shape
    Cin = C2 + C1
    w1, b1, w2, b2 = params["w1"], params["b1"], params["w2"], params["b2"]
    Cout = w1.shape[-1]
    HW = H * W
    PAD = W + 1                 # covers the max tap shift |dy*W + dx| = W + 1
    L = HW + 2 * PAD

    def flat_pad(x):
        xf = x.reshape(x.shape[0], x.shape[1], HW)
        xf = jnp.pad(xf, ((0, 0), (0, 0), (PAD, PAD)))
        return xf.astype(COMPUTE_DTYPE)            # bf16 halves HBM/DMA bytes

    xa = flat_pad(x2)            # (N, C2, L)  -- concat order [x2, x1] as torch
    xb = flat_pad(x1u)           # (N, C1, L)

    # Weights reshaped to (Cout, 9*Cin) with K ordered (ky, kx, ci).
    w1m = jnp.transpose(w1, (3, 0, 1, 2)).reshape(Cout, 9 * Cin).astype(COMPUTE_DTYPE)
    w2m = jnp.transpose(w2, (3, 0, 1, 2)).reshape(Cout, 9 * Cout).astype(COMPUTE_DTYPE)
    b1c = b1.reshape(Cout, 1).astype(jnp.float32)
    b2c = b2.reshape(Cout, 1).astype(jnp.float32)

    # Column-wrap masks for the dx = -1 / dx = +1 taps.
    col = jnp.arange(HW, dtype=jnp.int32) % W
    masks = jnp.stack([(col != 0), (col != W - 1)]).astype(COMPUTE_DTYPE)  # (2, HW)

    kernel = functools.partial(_double_conv_kernel, H=H, W=W, Cout=Cout, PAD=PAD)

    out_flat = pl.pallas_call(
        kernel,
        out_shape=jax.ShapeDtypeStruct((N, Cout, HW), x2.dtype),
        grid_spec=pltpu.PrefetchScalarGridSpec(
            num_scalar_prefetch=0,
            grid=(N,),
            in_specs=[
                pl.BlockSpec((None, C2, L), lambda n: (n, 0, 0)),
                pl.BlockSpec((None, C1, L), lambda n: (n, 0, 0)),
                pl.BlockSpec((Cout, 9 * Cin), lambda n: (0, 0)),
                pl.BlockSpec((Cout, 1), lambda n: (0, 0)),
                pl.BlockSpec((Cout, 9 * Cout), lambda n: (0, 0)),
                pl.BlockSpec((Cout, 1), lambda n: (0, 0)),
                pl.BlockSpec((2, HW), lambda n: (0, 0)),
            ],
            out_specs=pl.BlockSpec((None, Cout, HW), lambda n: (n, 0, 0)),
        ),
        compiler_params=pltpu.CompilerParams(
            dimension_semantics=("parallel",),
            vmem_limit_bytes=32 * 1024 * 1024,
        ),
    )(xa, xb, w1m, b1c, w2m, b2c, masks)

    return out_flat.reshape(N, Cout, H, W)


# ----------------------------------------------------------------------------
# Bilinear upsample, align_corners=True (exact nn.Upsample semantics),
# as two staged matmuls instead of a 4-operand einsum.
# ----------------------------------------------------------------------------
def _align_corners_matrix(in_size, out_size, dtype=jnp.float32):
    if out_size == 1:
        src = jnp.zeros((out_size,), jnp.float32)
    else:
        src = jnp.arange(out_size, dtype=jnp.float32) * ((in_size - 1) / (out_size - 1))
    idx = jnp.arange(in_size, dtype=jnp.float32)
    m = jnp.maximum(0.0, 1.0 - jnp.abs(src[:, None] - idx[None, :]))
    return m.astype(dtype)


def bilinear_upsample_nchw(x, scale):
    N, C, Hi, Wi = x.shape
    Mh = _align_corners_matrix(Hi, Hi * scale, x.dtype)   # (Ho, Hi)
    Mw = _align_corners_matrix(Wi, Wi * scale, x.dtype)   # (Wo, Wi)
    t = jnp.einsum("ncHW,wW->ncHw", x, Mw)                # contract input W
    return jnp.einsum("ncHw,hH->nchw", t, Mh)             # contract input H


# ----------------------------------------------------------------------------
# Up module: parameters + forward
# ----------------------------------------------------------------------------
def init_up_params(key, in_channels, out_channels, dtype=jnp.float32):
    k1, k2, k3, k4 = jax.random.split(key, 4)
    s1 = 1.0 / jnp.sqrt(in_channels * 9.0)
    s2 = 1.0 / jnp.sqrt(out_channels * 9.0)
    return {
        "w1": (jax.random.uniform(k1, (3, 3, in_channels, out_channels),
                                  dtype, -1.0, 1.0) * s1),
        "b1": (jax.random.uniform(k2, (out_channels,), dtype, -1.0, 1.0) * s1),
        "w2": (jax.random.uniform(k3, (3, 3, out_channels, out_channels),
                                  dtype, -1.0, 1.0) * s2),
        "b2": (jax.random.uniform(k4, (out_channels,), dtype, -1.0, 1.0) * s2),
    }


@functools.partial(jax.jit, static_argnames=("scaling",))
def up_forward(params, x1, x2, scaling=2):
    """x1, x2 are NCHW (PyTorch convention). Returns NCHW."""
    # 1) bilinear upsample (align_corners=True)
    x1u = bilinear_upsample_nchw(x1, scaling)
    # 2) pad x1 to match x2 spatially; lax.pad handles negative amounts by
    #    cropping, matching torch F.pad semantics.
    diffY = x2.shape[2] - x1u.shape[2]
    diffX = x2.shape[3] - x1u.shape[3]
    x1u = jax.lax.pad(
        x1u, jnp.zeros((), x1u.dtype),
        ((0, 0, 0), (0, 0, 0),
         (diffY // 2, diffY - diffY // 2, 0),
         (diffX // 2, diffX - diffX // 2, 0)))
    # 3+4) concat [x2, x1] + DoubleConv, fused into one Pallas kernel.
    return double_conv_up(x2, x1u, params)


if __name__ == "__main__":
    key = jax.random.PRNGKey(0)
    k_x1, k_x2, k_p = jax.random.split(key, 3)

    # Up(in_channels=8, out_channels=4): x1 has 4 channels (gets upsampled),
    # x2 has 4 channels at the target resolution; concat -> 8 channels.
    N, C1, H1, W1 = 2, 4, 16, 16
    C2, H2, W2 = 4, 32, 32
    out_channels = 4
    in_channels = C1 + C2

    x1 = jax.random.normal(k_x1, (N, C1, H1, W1), jnp.float32)
    x2 = jax.random.normal(k_x2, (N, C2, H2, W2), jnp.float32)
    params = init_up_params(k_p, in_channels, out_channels)

    out = up_forward(params, x1, x2, scaling=2)
    out = jax.block_until_ready(out)
    assert out.shape == (N, out_channels, H2, W2), out.shape
    print("KERNEL_OK")
</pallas_src>

<mosaic_0001>
module attributes {stable_mosaic.version = 11 : i64} {
  func.func @_double_conv_kernel(%arg0: i32, %arg1: memref<1x4x1090xbf16, #tpu.memory_space<vmem>>, %arg2: memref<1x4x1090xbf16, #tpu.memory_space<vmem>>, %arg3: memref<4x72xbf16, #tpu.memory_space<vmem>>, %arg4: memref<4x1xf32, #tpu.memory_space<vmem>>, %arg5: memref<4x36xbf16, #tpu.memory_space<vmem>>, %arg6: memref<4x1xf32, #tpu.memory_space<vmem>>, %arg7: memref<2x1024xbf16, #tpu.memory_space<vmem>>, %arg8: memref<1x4x1024xf32, #tpu.memory_space<vmem>>) attributes {dimension_semantics = [#tpu.dimension_semantics<parallel>], iteration_bounds = array<i64: 2>, scalar_prefetch = 0 : i64, scratch_operands = 0 : i64, tpu.core_type = #tpu.core_type<tc>, window_params = [{transform_indices = @transform_0, window_bounds = array<i64: 1, 4, 1090>}, {transform_indices = @transform_1, window_bounds = array<i64: 1, 4, 1090>}, {pipeline_mode = #tpu.pipeline_mode<synchronous>, transform_indices = @transform_2, window_bounds = array<i64: 4, 72>}, {pipeline_mode = #tpu.pipeline_mode<synchronous>, transform_indices = @transform_3, window_bounds = array<i64: 4, 1>}, {pipeline_mode = #tpu.pipeline_mode<synchronous>, transform_indices = @transform_4, window_bounds = array<i64: 4, 36>}, {pipeline_mode = #tpu.pipeline_mode<synchronous>, transform_indices = @transform_5, window_bounds = array<i64: 4, 1>}, {pipeline_mode = #tpu.pipeline_mode<synchronous>, transform_indices = @transform_6, window_bounds = array<i64: 2, 1024>}, {transform_indices = @transform_7, window_bounds = array<i64: 1, 4, 1024>}]} {
    %c0 = arith.constant 0 : index
    %c0_0 = arith.constant 0 : index
    %0 = vector.load %arg7[%c0, %c0_0] : memref<2x1024xbf16, #tpu.memory_space<vmem>>, vector<1x1024xbf16>
    %c1 = arith.constant 1 : index
    %c0_1 = arith.constant 0 : index
    %1 = vector.load %arg7[%c1, %c0_1] : memref<2x1024xbf16, #tpu.memory_space<vmem>>, vector<1x1024xbf16>
    %c0_2 = arith.constant 0 : index
    %c0_3 = arith.constant 0 : index
    %c0_4 = arith.constant 0 : index
    %2 = vector.load %arg1[%c0_2, %c0_3, %c0_4] : memref<1x4x1090xbf16, #tpu.memory_space<vmem>>, vector<1x4x1090xbf16>
    %3 = vector.shape_cast %2 : vector<1x4x1090xbf16> to vector<4x1090xbf16>
    %c0_5 = arith.constant 0 : index
    %c0_6 = arith.constant 0 : index
    %c0_7 = arith.constant 0 : index
    %4 = vector.load %arg2[%c0_5, %c0_6, %c0_7] : memref<1x4x1090xbf16, #tpu.memory_space<vmem>>, vector<1x4x1090xbf16>
    %5 = vector.shape_cast %4 : vector<1x4x1090xbf16> to vector<4x1090xbf16>
    %6 = tpu.concatenate %3, %5 in 0 : vector<4x1090xbf16>, vector<4x1090xbf16> -> vector<8x1090xbf16>
    %7 = vector.extract_strided_slice %6 {offsets = [0, 0], sizes = [8, 1024], strides = [1, 1]} : vector<8x1090xbf16> to vector<8x1024xbf16>
    %8 = vector.broadcast %0 : vector<1x1024xbf16> to vector<8x1024xbf16>
    %9 = arith.mulf %7, %8 : vector<8x1024xbf16>
    %10 = vector.extract_strided_slice %6 {offsets = [0, 1], sizes = [8, 1024], strides = [1, 1]} : vector<8x1090xbf16> to vector<8x1024xbf16>
    %11 = vector.extract_strided_slice %6 {offsets = [0, 2], sizes = [8, 1024], strides = [1, 1]} : vector<8x1090xbf16> to vector<8x1024xbf16>
    %12 = vector.broadcast %1 : vector<1x1024xbf16> to vector<8x1024xbf16>
    %13 = arith.mulf %11, %12 : vector<8x1024xbf16>
    %14 = vector.extract_strided_slice %6 {offsets = [0, 32], sizes = [8, 1024], strides = [1, 1]} : vector<8x1090xbf16> to vector<8x1024xbf16>
    %15 = vector.broadcast %0 : vector<1x1024xbf16> to vector<8x1024xbf16>
    %16 = arith.mulf %14, %15 : vector<8x1024xbf16>
    %17 = vector.extract_strided_slice %6 {offsets = [0, 33], sizes = [8, 1024], strides = [1, 1]} : vector<8x1090xbf16> to vector<8x1024xbf16>
    %18 = vector.extract_strided_slice %6 {offsets = [0, 34], sizes = [8, 1024], strides = [1, 1]} : vector<8x1090xbf16> to vector<8x1024xbf16>
    %19 = vector.broadcast %1 : vector<1x1024xbf16> to vector<8x1024xbf16>
    %20 = arith.mulf %18, %19 : vector<8x1024xbf16>
    %21 = vector.extract_strided_slice %6 {offsets = [0, 64], sizes = [8, 1024], strides = [1, 1]} : vector<8x1090xbf16> to vector<8x1024xbf16>
    %22 = vector.broadcast %0 : vector<1x1024xbf16> to vector<8x1024xbf16>
    %23 = arith.mulf %21, %22 : vector<8x1024xbf16>
    %24 = vector.extract_strided_slice %6 {offsets = [0, 65], sizes = [8, 1024], strides = [1, 1]} : vector<8x1090xbf16> to vector<8x1024xbf16>
    %25 = vector.extract_strided_slice %6 {offsets = [0, 66], sizes = [8, 1024], strides = [1, 1]} : vector<8x1090xbf16> to vector<8x1024xbf16>
    %26 = vector.broadcast %1 : vector<1x1024xbf16> to vector<8x1024xbf16>
    %27 = arith.mulf %25, %26 : vector<8x1024xbf16>
    %28 = tpu.concatenate %9, %10, %13, %16, %17, %20, %23, %24, %27 in 0 : vector<8x1024xbf16>, vector<8x1024xbf16>, vector<8x1024xbf16>, vector<8x1024xbf16>, vector<8x1024xbf16>, vector<8x1024xbf16>, vector<8x1024xbf16>, vector<8x1024xbf16>, vector<8x1024xbf16> -> vector<72x1024xbf16>
    %c0_8 = arith.constant 0 : index
    %c0_9 = arith.constant 0 : index
    %29 = vector.load %arg3[%c0_8, %c0_9] : memref<4x72xbf16, #tpu.memory_space<vmem>>, vector<4x72xbf16>
    %cst = arith.constant dense<0.000000e+00> : vector<4x1024xf32>
    %30 = tpu.matmul %29, %28, %cst {dimension_numbers = #tpu.dot_dimension_numbers<[1], [0], [0], [1], [0, 0, 1, 1], [], []>} : vector<4x72xbf16>, vector<72x1024xbf16>, vector<4x1024xf32> -> vector<4x1024xf32>
    %c0_10 = arith.constant 0 : index
    %c0_11 = arith.constant 0 : index
    %31 = vector.load %arg4[%c0_10, %c0_11] : memref<4x1xf32, #tpu.memory_space<vmem>>, vector<4x1xf32>
    %32 = vector.broadcast %31 : vector<4x1xf32> to vector<4x1024xf32>
    %33 = arith.addf %30, %32 : vector<4x1024xf32>
    %cst_12 = arith.constant 0.000000e+00 : f32
    %34 = vector.broadcast %cst_12 : f32 to vector<4x1024xf32>
    %35 = arith.maximumf %33, %34 : vector<4x1024xf32>
    %cst_13 = arith.constant 0.000000e+00 : bf16
    %36 = vector.broadcast %cst_13 : bf16 to vector<4x33xbf16>
    %37 = arith.truncf %35 : vector<4x1024xf32> to vector<4x1024xbf16>
    %38 = tpu.concatenate %36, %37, %36 in 1 : vector<4x33xbf16>, vector<4x1024xbf16>, vector<4x33xbf16> -> vector<4x1090xbf16>
    %39 = vector.extract_strided_slice %38 {offsets = [0, 0], sizes = [4, 1024], strides = [1, 1]} : vector<4x1090xbf16> to vector<4x1024xbf16>
    %40 = vector.broadcast %0 : vector<1x1024xbf16> to vector<4x1024xbf16>
    %41 = arith.mulf %39, %40 : vector<4x1024xbf16>
    %42 = vector.extract_strided_slice %38 {offsets = [0, 1], sizes = [4, 1024], strides = [1, 1]} : vector<4x1090xbf16> to vector<4x1024xbf16>
    %43 = vector.extract_strided_slice %38 {offsets = [0, 2], sizes = [4, 1024], strides = [1, 1]} : vector<4x1090xbf16> to vector<4x1024xbf16>
    %44 = vector.broadcast %1 : vector<1x1024xbf16> to vector<4x1024xbf16>
    %45 = arith.mulf %43, %44 : vector<4x1024xbf16>
    %46 = vector.extract_strided_slice %38 {offsets = [0, 32], sizes = [4, 1024], strides = [1, 1]} : vector<4x1090xbf16> to vector<4x1024xbf16>
    %47 = vector.broadcast %0 : vector<1x1024xbf16> to vector<4x1024xbf16>
    %48 = arith.mulf %46, %47 : vector<4x1024xbf16>
    %49 = vector.extract_strided_slice %38 {offsets = [0, 33], sizes = [4, 1024], strides = [1, 1]} : vector<4x1090xbf16> to vector<4x1024xbf16>
    %50 = vector.extract_strided_slice %38 {offsets = [0, 34], sizes = [4, 1024], strides = [1, 1]} : vector<4x1090xbf16> to vector<4x1024xbf16>
    %51 = vector.broadcast %1 : vector<1x1024xbf16> to vector<4x1024xbf16>
    %52 = arith.mulf %50, %51 : vector<4x1024xbf16>
    %53 = vector.extract_strided_slice %38 {offsets = [0, 64], sizes = [4, 1024], strides = [1, 1]} : vector<4x1090xbf16> to vector<4x1024xbf16>
    %54 = vector.broadcast %0 : vector<1x1024xbf16> to vector<4x1024xbf16>
    %55 = arith.mulf %53, %54 : vector<4x1024xbf16>
    %56 = vector.extract_strided_slice %38 {offsets = [0, 65], sizes = [4, 1024], strides = [1, 1]} : vector<4x1090xbf16> to vector<4x1024xbf16>
    %57 = vector.extract_strided_slice %38 {offsets = [0, 66], sizes = [4, 1024], strides = [1, 1]} : vector<4x1090xbf16> to vector<4x1024xbf16>
    %58 = vector.broadcast %1 : vector<1x1024xbf16> to vector<4x1024xbf16>
    %59 = arith.mulf %57, %58 : vector<4x1024xbf16>
    %60 = tpu.concatenate %41, %42, %45, %48, %49, %52, %55, %56, %59 in 0 : vector<4x1024xbf16>, vector<4x1024xbf16>, vector<4x1024xbf16>, vector<4x1024xbf16>, vector<4x1024xbf16>, vector<4x1024xbf16>, vector<4x1024xbf16>, vector<4x1024xbf16>, vector<4x1024xbf16> -> vector<36x1024xbf16>
    %c0_14 = arith.constant 0 : index
    %c0_15 = arith.constant 0 : index
    %61 = vector.load %arg5[%c0_14, %c0_15] : memref<4x36xbf16, #tpu.memory_space<vmem>>, vector<4x36xbf16>
    %cst_16 = arith.constant dense<0.000000e+00> : vector<4x1024xf32>
    %62 = tpu.matmul %61, %60, %cst_16 {dimension_numbers = #tpu.dot_dimension_numbers<[1], [0], [0], [1], [0, 0, 1, 1], [], []>} : vector<4x36xbf16>, vector<36x1024xbf16>, vector<4x1024xf32> -> vector<4x1024xf32>
    %c0_17 = arith.constant 0 : index
    %c0_18 = arith.constant 0 : index
    %63 = vector.load %arg6[%c0_17, %c0_18] : memref<4x1xf32, #tpu.memory_space<vmem>>, vector<4x1xf32>
    %64 = vector.broadcast %63 : vector<4x1xf32> to vector<4x1024xf32>
    %65 = arith.addf %62, %64 : vector<4x1024xf32>
    %cst_19 = arith.constant 0.000000e+00 : f32
    %66 = vector.broadcast %cst_19 : f32 to vector<4x1024xf32>
    %67 = arith.maximumf %65, %66 : vector<4x1024xf32>
    %c0_20 = arith.constant 0 : index
    %c0_21 = arith.constant 0 : index
    %c0_22 = arith.constant 0 : index
    %68 = vector.load %arg8[%c0_20, %c0_21, %c0_22] : memref<1x4x1024xf32, #tpu.memory_space<vmem>>, vector<1x4x1024xf32>
    %69 = vector.shape_cast %68 : vector<1x4x1024xf32> to vector<4x1024xf32>
    %70 = vector.shape_cast %67 : vector<4x1024xf32> to vector<1x4x1024xf32>
    tpu.vector_store %arg8[%c0_20, %c0_21, %c0_22], %70 {strides = array<i32>} : memref<1x4x1024xf32, #tpu.memory_space<vmem>>, vector<1x4x1024xf32>,
    return
  }
  func.func @transform_0(%arg0: i32) -> (i32, i32, i32) {
    %c0_i32 = arith.constant 0 : i32
    %c0_i32_0 = arith.constant 0 : i32
    %c0_i32_1 = arith.constant 0 : i32
    return %arg0, %c0_i32, %c0_i32_0 : i32, i32, i32
  }
  func.func @transform_1(%arg0: i32) -> (i32, i32, i32) {
    %c0_i32 = arith.constant 0 : i32
    %c0_i32_0 = arith.constant 0 : i32
    %c0_i32_1 = arith.constant 0 : i32
    return %arg0, %c0_i32, %c0_i32_0 : i32, i32, i32
  }
  func.func @transform_2(%arg0: i32) -> (i32, i32) {
    %c0_i32 = arith.constant 0 : i32
    %c0_i32_0 = arith.constant 0 : i32
    %c0_i32_1 = arith.constant 0 : i32
    return %c0_i32, %c0_i32_0 : i32, i32
  }
  func.func @transform_3(%arg0: i32) -> (i32, i32) {
    %c0_i32 = arith.constant 0 : i32
    %c0_i32_0 = arith.constant 0 : i32
    %c0_i32_1 = arith.constant 0 : i32
    return %c0_i32, %c0_i32_0 : i32, i32
  }
  func.func @transform_4(%arg0: i32) -> (i32, i32) {
    %c0_i32 = arith.constant 0 : i32
    %c0_i32_0 = arith.constant 0 : i32
    %c0_i32_1 = arith.constant 0 : i32
    return %c0_i32, %c0_i32_0 : i32, i32
  }
  func.func @transform_5(%arg0: i32) -> (i32, i32) {
    %c0_i32 = arith.constant 0 : i32
    %c0_i32_0 = arith.constant 0 : i32
    %c0_i32_1 = arith.constant 0 : i32
    return %c0_i32, %c0_i32_0 : i32, i32
  }
  func.func @transform_6(%arg0: i32) -> (i32, i32) {
    %c0_i32 = arith.constant 0 : i32
    %c0_i32_0 = arith.constant 0 : i32
    %c0_i32_1 = arith.constant 0 : i32
    return %c0_i32, %c0_i32_0 : i32, i32
  }
  func.func @transform_7(%arg0: i32) -> (i32, i32, i32) {
    %c0_i32 = arith.constant 0 : i32
    %c0_i32_0 = arith.constant 0 : i32
    %c0_i32_1 = arith.constant 0 : i32
    return %arg0, %c0_i32, %c0_i32_0 : i32, i32, i32
  }
}

</mosaic_0001>

<bundles_post_ra>
// kernel: up_forward.1
= control target key start
LH: loop header
LB: loop body
LE: loop exit
PB: predicated region body
PF: predicated region fallthrough
CT: control target
= control target key end

     0   :  { %s2426_s24 = smov 0   ;;  %s3744_s0 = inlined_call_operand.vmem [shape: bf16[2,4,1090], index: 0, kind: input, shape index: {}]   ;;  %s3745_s1 = inlined_call_operand.vmem [shape: bf16[2,4,1090], index: 1, kind: input, shape index: {}]   ;;  %s3746_s2 = inlined_call_operand.vmem [shape: bf16[4,72], index: 2, kind: input, shape index: {}]   ;;  %s3747_s3 = inlined_call_operand.vmem [shape: f32[4,1], index: 3, kind: input, shape index: {}]   ;;  %s3748_s4 = inlined_call_operand.vmem [shape: bf16[4,36], index: 4, kind: input, shape index: {}]   ;;  %s3749_s5 = inlined_call_operand.vmem [shape: f32[4,1], index: 5, kind: input, shape index: {}]   ;;  %s3750_s6 = inlined_call_operand.vmem [shape: bf16[2,1024], index: 6, kind: input, shape index: {}]   ;;  %s3751_s7 = inlined_call_operand.vmem [shape: f32[2,4,1024], index: 7, kind: output, shape index: {}]  }
   0x1 LB: > { %s2301_s25 = sadd.s32 4294967295, %s2368_s24   ;;  %p2305_p0 = scmp.ge.s32.totalorder %s2368_s24, 1  ;;  %s2368_s24 = sphi %s2426_s24, %s17_s24  }
   0x2   : > { %p247_p1 = scmp.lt.s32.totalorder %s2368_s24, 3 }
   0x4   : > { %p248_p2 = pnand %p2305_p0, %p247_p1 }
   0x6   : > { %251 = sbr.rel (%p248_p2) target bundleno = 1179 (0x49b), region = 48 }
   0xd   : > { %v314_v0 = vlaneseq  ;;  %v2370_v1 = vmov 1966171168   ;;  %p284_p3 = scmp.lt.s32.totalorder %s2301_s25, 1  ;;  %v300_v5 = vld [vmem:[%s3750_s6] sm:$0xff]  ;;  %v2371_v8 = vmov 1983009808  }
   0xe   : > { %v436_v2 = vunpack.c.l.s4 %v2370_v1  ;;  %v312_v9 = vunpack.c.l.s4 %v2371_v8  ;;  %s2372_s12 = smov 64   ;;  %s2373_s13 = smov 32   ;;  %v434_v30 = vcombine.high %v300_v5, %v300_v5  ;;  %vm396_vm0 = vcmask 1041408  }
   0xf   : > { %v315_v3 = vshrl.u32 %v314_v0, 7  ;;  %s3837_s25 = smov (!%p284_p3, %s2301_s25), 1  ;;  %s2374_s14 = smov 2   ;;  %vm761_vm1 = vcmask 523264   ;;  %vm677_vm2 = vcmask 261120   ;;  %vm627_vm3 = vcmask 15360  }
  0x10   : > { %v437_v4 = vunpack.c.0.s8 %v436_v2  ;;  %s2330_s28 = smul.u32 18, %s3837_s25  ;;  %v313_v17 = vunpack.c.0.s8 %v312_v9  ;;  %s2375_s15 = smov 34   ;;  %vm719_vm4 = vcmask 277504   ;;  %vm803_vm5 = vcmask 539648  }
  0x11   : > { %v2444_v11 = vsub.s32 0, %v315_v3  ;;  %s2376_s16 = smov 66   ;;  %s2377_s17 = smov 127   ;;  %vm865_vm6 = vcmask 1039360   ;;  %vm1125_vm7 = vcmask 1043456   ;;  %vm901_vm8 = vcmask 1031168  }
  0x12   : > { %v2437_v6 = vsub.s32 %v437_v4, %v315_v3  ;;  %s2449_s8 = scalar_lea.vmem %s3745_s1, %s2330_s28  ;;  %s2458_s11 = scalar_lea.vmem %s3744_s0, %s2330_s28  ;;  %v2470_v26 = vsub.s32 %v313_v17, %v315_v3  ;;  %vm946_vm9 = vcmask 785408   ;;  %vm973_vm10 = vcmask 777216  }
  0x13   : > { %v301_v27 = vld [vmem:[%s2458_s11] sm:$0xff]  ;;  %v2482_v37 = vld [vmem:[%s2458_s11 + $0x8] sm:$0xff]  ;;  %s2378_s18 = smov 95   ;;  %s2379_s19 = smov 63   ;;  %vm1018_vm11 = vcmask 769024   ;;  %vm1080_vm12 = vcmask 515072  }
  0x14   : > { %v441_v7 = vrot.slane %v300_v5, %v2437_v6  ;;  %v304_v31 = vld [vmem:[%s2449_s8] sm:$0xff]  ;;  %v317_v33 = vrot.slane %v301_v27, %v2470_v26  ;;  %v310_v35 = vcombine.high %v301_v27, %v301_v27  ;;  %v448_v40 = vrot.slane %v434_v30, %v2437_v6  ;;  %v2492_v44 = vld [vmem:[%s2449_s8 + $0x8] sm:$0xff]  ;;  %s2380_s20 = smov 96   ;;  %s2381_s21 = smov 126  }
  0x15   : > { %v354_v34 = vcombine.low %v304_v31, %v304_v31  ;;  %v368_v36 = vrot.slane %v304_v31, %v2470_v26  ;;  %v334_v46 = vrot.slane %v2482_v37, %v2470_v26  ;;  %v371_v52 = vcombine.low %v2492_v44, %v2492_v44  ;;  %s2382_s22 = smov 94   ;;  %s2383_s23 = smov 62  }
  0x16   : > { %v457_v10 = vrot.slane %v441_v7, %v2437_v6  ;;  %v449_v12 = vcombine.high %v441_v7, %v441_v7  ;;  %v325_v41 = vcombine.high %v317_v33, %v317_v33  ;;  %v324_v43 = vrot.slane %v310_v35, %v2470_v26  ;;  %s2385_s30 = smov 33  }
  0x17   : > { %v361_v42 = vrot.slane %v354_v34, %v2470_v26  ;;  %v370_v45 = vcombine.high %v368_v36, %v368_v36  ;;  %v464_v51 = vrot.slane %v448_v40, %v2437_v6  ;;  %v378_v56 = vrot.slane %v371_v52, %v2470_v26  ;;  %v2310_v34 = vld.sshfl [vmem:[%s2458_s11 + $0x10] sm:$0x3 pattern:$0x76325410] }
  0x18   : > { %v484_v13 = vpack.i.b16 %v457_v10, %v457_v10  ;;  %v479_v14 = vcombine.high %v457_v10, %v457_v10  ;;  %v471_v15 = vrot.slane %v449_v12, %v2437_v6  ;;  %v547_v16 = vshrl.u32 %v457_v10, 16 }
  0x19   : > { %v369_v47 = vcombine.high %v361_v42, %v361_v42  ;;  %v2497_v48 = vsel %vm396_vm0, %v317_v33, %v361_v42  ;;  %v2500_v49 = vsel %vm396_vm0, %v324_v43, %v368_v36  ;;  %v326_v50 = vcombine.high %v324_v43, %v324_v43 }
  0x1a   : > { %v2453_v18 = vrot.slane %v484_v13, %v2444_v11  ;;  %v498_v19 = vpack.i.b16 %v479_v14, %v479_v14  ;;  %v491_v20 = vpack.i.b16 %v471_v15, %v471_v15  ;;  %v561_v21 = vshrl.u32 %v479_v14, 16 }
  0x1b   : > { %v554_v22 = vshrl.u32 %v471_v15, 16  ;;  %v548_v25 = vpack.i.b16 %v547_v16, %v547_v16  ;;  %v481_v53 = vcombine.high %v471_v15, %v471_v15  ;;  %v2508_v54 = vsel %vm396_vm0, %v325_v41, %v369_v47 }
  0x1c   : > { %3782 = vst [vmem:[#allocation2_spill] sm:$0xff] %v2453_v18  ;;  %745 = vrot.lane.b32.xlu1 %v2453_v18, %s2372_s12  ;;  %661 = vrot.lane.b32.xlu0 %v2453_v18, %s2373_s13  ;;  %v2465_v23 = vrot.slane %v498_v19, %v2444_v11  ;;  %v2468_v24 = vrot.slane %v491_v20, %v2444_v11  ;;  %v575_v61 = vshrl.u32 %v464_v51, 16  ;;  %v840_v42 = vrot.slane %v2500_v49, 4 }
  0x1d   : > { %v562_v28 = vpack.i.b16 %v561_v21, %v561_v21  ;;  %v555_v29 = vpack.i.b16 %v554_v22, %v554_v22  ;;  %v553_v32 = vrot.slane %v548_v25, %v2444_v11  ;;  %v2511_v55 = vsel %vm396_vm0, %v326_v50, %v370_v45 }
  0x1e   : > { %3783 = vst [vmem:[#allocation3_spill] sm:$0xff] %v2465_v23  ;;  %3784 = vst [vmem:[#allocation4_spill] sm:$0xff] %v2468_v24  ;;  %v512_v57 = vpack.i.b16 %v464_v51, %v464_v51  ;;  %v2515_v58 = vsel %vm396_vm0, %v334_v46, %v378_v56  ;;  %v505_v59 = vpack.i.b16 %v481_v53, %v481_v53  ;;  %v568_v60 = vshrl.u32 %v481_v53, 16 }
  0x1f   : > { %v567_v38 = vrot.slane %v562_v28, %v2444_v11  ;;  %v560_v39 = vrot.slane %v555_v29, %v2444_v11  ;;  %v576_v1 = vpack.i.b16 %v575_v61, %v575_v61  ;;  %v450_v4 = vcombine.high %v448_v40, %v448_v40 }
  0x20   : > { %665 = vrot.lane.b32.xlu1 %v2465_v23, %s2373_s13  ;;  %663 = vrot.lane.b32.xlu0 %v2468_v24, %s2373_s13  ;;  %v2520_v62 = vrot.slane %v512_v57, %v2444_v11  ;;  %v2527_v63 = vrot.slane %v505_v59, %v2444_v11  ;;  %v569_v0 = vpack.i.b16 %v568_v60, %v568_v60  ;;  %v3752_v43 = vrot.slane %v2515_v58, 4 }
  0x21   : > { %v581_v3 = vrot.slane %v576_v1, %v2444_v11  ;;  %v342_v5 = vcombine.high %v334_v46, %v334_v46  ;;  %v386_v7 = vcombine.high %v378_v56, %v378_v56  ;;  %v478_v9 = vrot.slane %v450_v4, %v2437_v6 }
  0x22   : > { %3785 = vst [vmem:[#allocation5_spill] sm:$0xff] %v2527_v63  ;;  %v574_v2 = vrot.slane %v569_v0, %v2444_v11  ;;  %v480_v12 = vcombine.high %v464_v51, %v464_v51  ;;  %v327_v25 = vcombine.high %v2482_v37, %v2482_v37  ;;  %v385_v30 = vrot.slane %v2492_v44, %v2470_v26 }
  0x23   : > { %v2536_v8 = vsel %vm396_vm0, %v342_v5, %v386_v7  ;;  %v519_v10 = vpack.i.b16 %v478_v9, %v478_v9  ;;  %v582_v14 = vshrl.u32 %v478_v9, 16  ;;  %v482_v22 = vcombine.high %v478_v9, %v478_v9 }
  0x24   : > { %611 = vrot.lane.b32.xlu1 %v553_v32, %s2374_s14  ;;  %703 = vrot.lane.b32.xlu0 %v553_v32, %s2375_s15  ;;  %v526_v15 = vpack.i.b16 %v480_v12, %v480_v12  ;;  %v589_v17 = vshrl.u32 %v480_v12, 16  ;;  %v341_v29 = vrot.slane %v327_v25, %v2470_v26  ;;  %v387_v36 = vcombine.high %v385_v30, %v385_v30 }
  0x25   : > { %v2546_v13 = vrot.slane %v519_v10, %v2444_v11  ;;  %v583_v6 = vpack.i.b16 %v582_v14, %v582_v14  ;;  %v533_v27 = vpack.i.b16 %v482_v22, %v482_v22  ;;  %v596_v28 = vshrl.u32 %v482_v22, 16 }
  0x26   : > { %v2552_v16 = vrot.slane %v526_v15, %v2444_v11  ;;  %v590_v20 = vpack.i.b16 %v589_v17, %v589_v17  ;;  %v343_v35 = vcombine.high %v341_v29, %v341_v29  ;;  %v841_v44 = vrot.slane %v2511_v55, 4 }
  0x27   : > { %v588_v19 = vrot.slane %v583_v6, %v2444_v11  ;;  %v2573_v31 = vrot.slane %v533_v27, %v2444_v11  ;;  %v597_v33 = vpack.i.b16 %v596_v28, %v596_v28  ;;  %vm1116_vm13 = vcmask 506880  }
  0x28   : > { %615 = vrot.lane.b32.xlu1 %v567_v38, %s2374_s14  ;;  %613 = vrot.lane.b32.xlu0 %v560_v39, %s2374_s14  ;;  %v595_v21 = vrot.slane %v590_v20, %v2444_v11  ;;  %vm1261_vm14 = vcmask 588800   ;;  %vm1493_vm15 = vcmask 269312  }
  0x29   : > { %v602_v41 = vrot.slane %v597_v33, %v2444_v11  ;;  %v838_v11 = vrot.slane %v2497_v48, 4 }
  0x2c   : > { %705 = vrot.lane.b32.xlu1 %v560_v39, %s2375_s15  ;;  %707 = vrot.lane.b32.xlu0 %v567_v38, %s2375_s15 }
  0x30   : > { %749 = vrot.lane.b32.xlu1 %v2465_v23, %s2372_s12  ;;  %747 = vrot.lane.b32.xlu0 %v2468_v24, %s2372_s12 }
  0x34   : > { %667 = vrot.lane.b32.xlu0 %v2527_v63, %s2373_s13  ;;  %669 = vrot.lane.b32.xlu1 %v2520_v62, %s2373_s13 }
  0x38   : > { %617 = vrot.lane.b32.xlu0 %v574_v2, %s2374_s14  ;;  %619 = vrot.lane.b32.xlu1 %v581_v3, %s2374_s14 }
  0x3c   : > { %709 = vrot.lane.b32.xlu0 %v574_v2, %s2375_s15  ;;  %711 = vrot.lane.b32.xlu1 %v581_v3, %s2375_s15 }
  0x40   : > { %787 = vrot.lane.b32.xlu0 %v553_v32, %s2376_s16  ;;  %789 = vrot.lane.b32.xlu1 %v560_v39, %s2376_s16  ;;  %v2361_v32 = vld [vmem:[%s2449_s8 + $0x10] ss:$0 sps:$4 sm:$0x33]   ;;  %v2585_v39 = vsel %vm396_vm0, %v341_v29, %v385_v30 }
  0x41   : > { %v395_v37 = vrot.slane %v2361_v32, %v2470_v26  ;;  %v839_v26 = vrot.slane %v2508_v54, 4 }
  0x43   : > { %v2588_v40 = vsel %vm396_vm0, %v2310_v34, %v395_v37 }
  0x44   : > { %671 = vrot.lane.b32.xlu1 %v2546_v13, %s2373_s13  ;;  %791 = vrot.lane.b32.xlu0 %v567_v38, %s2376_s16  ;;  %v2582_v38 = vsel %vm396_vm0, %v343_v35, %v387_v36 }
  0x48   : > { %751 = vrot.lane.b32.xlu1 %v2527_v63, %s2372_s12  ;;  %673 = vrot.lane.b32.xlu0 %v2552_v16, %s2373_s13 }
  0x4c   : > { %621 = vrot.lane.b32.xlu1 %v588_v19, %s2374_s14  ;;  %753 = vrot.lane.b32.xlu0 %v2520_v62, %s2372_s12 }
  0x50   : > { %713 = vrot.lane.b32.xlu1 %v588_v19, %s2375_s15  ;;  %623 = vrot.lane.b32.xlu0 %v595_v21, %s2374_s14 }
  0x54   : > { %793 = vrot.lane.b32.xlu1 %v574_v2, %s2376_s16  ;;  %715 = vrot.lane.b32.xlu0 %v595_v21, %s2375_s15 }
  0x58   : > { %755 = vrot.lane.b32.xlu1 %v2546_v13, %s2372_s12  ;;  %795 = vrot.lane.b32.xlu0 %v581_v3, %s2376_s16 }
  0x5c   : > { %675 = vrot.lane.b32.xlu1 %v2573_v31, %s2373_s13  ;;  %757 = vrot.lane.b32.xlu0 %v2552_v16, %s2372_s12 }
  0x60   : > { %625 = vrot.lane.b32.xlu0 %v602_v41, %s2374_s14  ;;  %717 = vrot.lane.b32.xlu1 %v602_v41, %s2375_s15 }
  0x64   : > { %797 = vrot.lane.b32.xlu0 %v588_v19, %s2376_s16  ;;  %799 = vrot.lane.b32.xlu1 %v595_v21, %s2376_s16 }
  0x68   : > { %759 = vrot.lane.b32.xlu0 %v2573_v31, %s2372_s12  ;;  %801 = vrot.lane.b32.xlu1 %v602_v41, %s2376_s16 }
  0x6c   : > { %849 = vrot.lane.b32.xlu0 %v839_v26, %s2377_s17  ;;  %851 = vrot.lane.b32.xlu1 %v840_v42, %s2377_s17 }
  0x70   : > { %847 = vrot.lane.b32.xlu0 %v838_v11, %s2377_s17  ;;  %957 = vrot.lane.b32.xlu1 %v2508_v54, %s2378_s18 }
  0x74   : > { %959 = vrot.lane.b32.xlu0 %v2500_v49, %s2378_s18  ;;  %955 = vrot.lane.b32.xlu1 %v2497_v48, %s2378_s18 }
  0x78   : > { %855 = vrot.lane.b32.xlu0 %v3752_v43, %s2377_s17  ;;  %853 = vrot.lane.b32.xlu1 %v841_v44, %s2377_s17 }
  0x7c   : > { %1066 = vrot.lane.b32.xlu0 %v840_v42, %s2379_s19  ;;  %1064 = vrot.lane.b32.xlu1 %v839_v26, %s2379_s19 }
  0x80   : > { %1062 = vrot.lane.b32.xlu0 %v838_v11, %s2379_s19 }
  0x8e   : > { %v2625_v45 = vpop.permute.xlu1 %745  ;;  %v2627_v46 = vpop.permute.xlu0 %661 }
  0x8f   : > { %v694_v47 = vmul.bf16 %v2627_v46, %v2497_v48  ;;  %v778_v50 = vmul.bf16 %v2625_v45, %v2497_v48 }
  0x91   : > { %v919_v51 = vrot.slane %v694_v47, 4  ;;  %1036 = vrot.lane.b32.xlu1 %v778_v50, %s2372_s12 }
  0x92   : > { %v2634_v52 = vpop.permute.xlu1 %665  ;;  %v664_v53 = vpop.permute.xlu0 %663 }
  0x93   : > { %928 = vrot.lane.b32.xlu0 %v919_v51, %s2380_s20  ;;  %v2667_v14 = vsel %vm677_vm2, %v664_v53, %v2634_v52  ;;  %v2719_v26 = vsel %vm677_vm2, %v2627_v46, %v664_v53 }
  0x94   : > { %v696_v20 = vmul.bf16 %v2667_v14, %v2500_v49 }
  0x96   : > { %v2637_v56 = vpop.permute.xlu1 %611  ;;  %v2639_v57 = vpop.permute.xlu0 %703  ;;  %v921_v25 = vrot.slane %v696_v20, 4 }
  0x97   : > { %v644_v59 = vmul.bf16 %v2637_v56, %v2497_v48  ;;  %v736_v7 = vmul.bf16 %v2639_v57, %v2497_v48 }
  0x99   : > { %883 = vrot.lane.b32.xlu1 %v644_v59, %s2381_s21  ;;  %v991_v12 = vrot.slane %v736_v7, 4 }
  0x9a   : > { %v2644_v60 = vpop.permute.xlu1 %615  ;;  %v614_v61 = vpop.permute.xlu0 %613 }
  0x9b   : > { %v2671_v15 = vsel %vm627_vm3, %v614_v61, %v2644_v60  ;;  %v2723_v42 = vsel %vm627_vm3, %v2637_v56, %v614_v61  ;;  %v695_v61 = vmul.bf16 %v2719_v26, %v2508_v54 }
  0x9c   : > { %v646_v19 = vmul.bf16 %v2671_v15, %v2500_v49  ;;  %v645_v59 = vmul.bf16 %v2723_v42, %v2508_v54 }
  0x9d   : > { %v920_v20 = vrot.slane %v695_v61, 4 }
  0x9e   : > { %v2646_v0 = vpop.permute.xlu1 %705  ;;  %v2648_v1 = vpop.permute.xlu0 %707 }
  0x9f   : > { %v2690_v27 = vsel %vm719_vm4, %v2646_v0, %v2648_v1 }
  0xa0   : > { %v738_v35 = vmul.bf16 %v2690_v27, %v2500_v49 }
  0xa2   : > { %v2650_v2 = vpop.permute.xlu1 %749  ;;  %v748_v3 = vpop.permute.xlu0 %747  ;;  %v993_v11 = vrot.slane %v738_v35, 4 }
  0xa3   : > { %v2654_v4 = vsel %vm761_vm1, %v748_v3, %v2650_v2  ;;  %v2703_v33 = vsel %vm761_vm1, %v2625_v45, %v748_v3 }
  0xa4   : > { %v780_v5 = vmul.bf16 %v2654_v4, %v2500_v49  ;;  %v779_v41 = vmul.bf16 %v2703_v33, %v2508_v54 }
  0xa6   : > { %v2660_v9 = vpop.permute.xlu0 %667  ;;  %v2662_v10 = vpop.permute.xlu1 %669  ;;  %1040 = vrot.lane.b32.xlu0 %v780_v5, %s2372_s12 }
  0xa7   : > { %v2728_v47 = vsel %vm677_vm2, %v2660_v9, %v2662_v10 }
  0xa8   : > { %3786 = vst [vmem:[#allocation6_spill] sm:$0xff] %v2728_v47  ;;  %v698_v5 = vmul.bf16 %v2728_v47, %v2515_v58 }
  0xaa   : > { %v2673_v6 = vpop.permute.xlu0 %617  ;;  %v2675_v17 = vpop.permute.xlu1 %619  ;;  %1000 = vrot.lane.b32.xlu0 %v991_v12, %s2382_s22 }
  0xab   : > { %v2733_v50 = vsel %vm627_vm3, %v2673_v6, %v2675_v17 }
  0xac   : > { %3787 = vst [vmem:[#allocation7_spill] sm:$0xff] %v2733_v50  ;;  %v648_v3 = vmul.bf16 %v2733_v50, %v2515_v58 }
  0xae   : > { %v2682_v21 = vpop.permute.xlu0 %709  ;;  %v2684_v22 = vpop.permute.xlu1 %711  ;;  %887 = vrot.lane.b32.xlu0 %v646_v19, %s2381_s21 }
  0xb2   : > { %v2692_v28 = vpop.permute.xlu0 %787  ;;  %v790_v29 = vpop.permute.xlu1 %789  ;;  %932 = vrot.lane.b32.xlu0 %v921_v25, %s2380_s20  ;;  %v2762_v25 = vsel %vm719_vm4, %v2639_v57, %v2646_v0 }
  0xb3   : > { %v2697_v30 = vsel %vm803_vm5, %v2692_v28, %v790_v29  ;;  %v820_v32 = vmul.bf16 %v2692_v28, %v2497_v48  ;;  %v737_v0 = vmul.bf16 %v2762_v25, %v2508_v54 }
  0xb4   : > { %v821_v34 = vmul.bf16 %v2697_v30, %v2508_v54 }
  0xb5   : > { %1098 = vrot.lane.b32.xlu1 %v820_v32, %s2383_s23  ;;  %v923_v32 = vrot.slane %v698_v5, 4  ;;  %v992_v61 = vrot.slane %v737_v0, 4  ;;  %v2796_v5 = vsel %vm627_vm3, %v2644_v60, %v2673_v6 }
  0xb6   : > { %v2710_v36 = vpop.permute.xlu1 %671  ;;  %1100 = vrot.lane.b32.xlu0 %v821_v34, %s2383_s23  ;;  %v2713_v37 = vpop.permute.xlu0 %791  ;;  %v2767_v34 = vsel %vm719_vm4, %v2648_v1, %v2682_v21 }
  0xb7   : > { %v2755_v12 = vsel %vm803_vm5, %v790_v29, %v2713_v37 }
  0xb8   : > { %v822_v29 = vmul.bf16 %v2755_v12, %v2500_v49 }
  0xb9   : > { %1038 = vrot.lane.b32.xlu1 %v779_v41, %s2372_s12 }
  0xba   : > { %v2736_v51 = vpop.permute.xlu1 %751  ;;  %1004 = vrot.lane.b32.xlu0 %v993_v11, %s2382_s22  ;;  %v2739_v53 = vpop.permute.xlu0 %673  ;;  %v739_v11 = vmul.bf16 %v2767_v34, %v2511_v55 }
  0xbd   : > { %885 = vrot.lane.b32.xlu1 %v645_v59, %s2381_s21 }
  0xbe   : > { %v2750_v7 = vpop.permute.xlu1 %621  ;;  %891 = vrot.lane.b32.xlu0 %v648_v3, %s2381_s21  ;;  %v2757_v19 = vpop.permute.xlu0 %753  ;;  %v2791_v3 = vsel %vm677_vm2, %v2634_v52, %v2660_v9  ;;  %v647_v52 = vmul.bf16 %v2796_v5, %v2511_v55  ;;  %v2815_v9 = vsel %vm761_vm1, %v2650_v2, %v2736_v51 }
  0xbf   : > { %3788 = vst [vmem:[#allocation8_spill] sm:$0xff] %v2791_v3  ;;  %v697_v60 = vmul.bf16 %v2791_v3, %v2511_v55  ;;  %v781_v2 = vmul.bf16 %v2815_v9, %v2511_v55  ;;  %v2868_v47 = vsel %vm761_vm1, %v2736_v51, %v2757_v19 }
  0xc0   : > { %3795 = vst [vmem:[#allocation15_spill] sm:$0xff] %v2868_v47  ;;  %v782_v51 = vmul.bf16 %v2868_v47, %v2515_v58 }
  0xc1   : > { %930 = vrot.lane.b32.xlu1 %v920_v20, %s2380_s20  ;;  %v994_v20 = vrot.slane %v739_v11, 4 }
  0xc2   : > { %v2772_v35 = vpop.permute.xlu1 %713  ;;  %936 = vrot.lane.b32.xlu0 %v923_v32, %s2380_s20  ;;  %v2775_v41 = vpop.permute.xlu0 %623  ;;  %v3753_v32 = vmov 0  }
  0xc3   : > { %1321 = vmatprep.mubr.bf16.mxu0 %v3753_v32  ;;  %1362 = vmatprep.mubr.bf16.mxu1 %v3753_v32 }
  0xc4   : > { %2355 = vset.pattern.permute.xlu0 %v3753_v32 }
  0xc5   : > { %1102 = vrot.lane.b32.xlu1 %v822_v29, %s2383_s23  ;;  %v3755_v29 = vrot.slane %v2536_v8, 4 }
  0xc6   : > { %v2782_v1 = vpop.permute.xlu1 %793  ;;  %961 = vrot.lane.b32.xlu0 %v2511_v55, %s2378_s18  ;;  %v2786_v59 = vpop.permute.xlu0 %715 }
  0xc9   : > { %1002 = vrot.lane.b32.xlu1 %v992_v61, %s2382_s22  ;;  %v922_v61 = vrot.slane %v697_v60, 4  ;;  %v2843_v60 = vsel %vm677_vm2, %v2662_v10, %v2710_v36 }
  0xca   : > { %1006 = vrot.lane.b32.xlu0 %v994_v20, %s2382_s22  ;;  %v2802_v0 = vpop.permute.xlu1 %755  ;;  %v2804_v43 = vpop.permute.xlu0 %795  ;;  %v2828_v20 = vsel %vm719_vm4, %v2682_v21, %v2684_v22  ;;  %3793 = vst [vmem:[#allocation13_spill] sm:$0xff] %v2843_v60  ;;  %v2848_v21 = vsel %vm627_vm3, %v2675_v17, %v2750_v7  ;;  %v699_v50 = vmul.bf16 %v2843_v60, %v2536_v8  ;;  %v3763_v17 = vrot.slane %v2585_v39, 4 }
  0xcb   : > { %3790 = vst [vmem:[#allocation10_spill] sm:$0xff] %v2828_v20  ;;  %3794 = vst [vmem:[#allocation14_spill] sm:$0xff] %v2848_v21  ;;  %v649_v10 = vmul.bf16 %v2848_v21, %v2536_v8  ;;  %v540_v60 = vmul.bf16 %v2468_v24, %v2508_v54  ;;  %v539_v24 = vmul.bf16 %v2453_v18, %v2497_v48 }
  0xcc   : > { %v924_v3 = vrot.slane %v699_v50, 4  ;;  %v2908_v48 = vsel %vm677_vm2, %v2710_v36, %v2739_v53 }
  0xcd   : > { %889 = vrot.lane.b32.xlu1 %v647_v52, %s2381_s21 }
  0xce   : > { %857 = vrot.lane.b32.xlu0 %v3755_v29, %s2377_s17  ;;  %v2821_v6 = vpop.permute.xlu1 %675  ;;  %v2823_v11 = vpop.permute.xlu0 %757  ;;  %v740_v29 = vmul.bf16 %v2828_v20, %v2515_v58 }
  0xcf   : > { %3789 = vst [vmem:[#allocation9_spill] sm:$0xff] %v2821_v6 }
  0xd0   : > { %v995_v20 = vrot.slane %v740_v29, 4 }
  0xd1   : > { %934 = vrot.lane.b32.xlu1 %v922_v61, %s2380_s20 }
  0xd2   : > { %1042 = vrot.lane.b32.xlu0 %v781_v2, %s2372_s12  ;;  %v2834_v52 = vpop.permute.xlu0 %625  ;;  %v2836_v32 = vpop.permute.xlu1 %717 }
  0xd3   : > { %3791 = vst [vmem:[#allocation11_spill] sm:$0xff] %v2834_v52  ;;  %3792 = vst [vmem:[#allocation12_spill] sm:$0xff] %v2836_v32 }
  0xd5   : > { %963 = vrot.lane.b32.xlu1 %v2515_v58, %s2378_s18 }
  0xd6   : > { %1068 = vrot.lane.b32.xlu0 %v841_v44, %s2379_s19  ;;  %v2855_v61 = vpop.permute.xlu0 %797  ;;  %v2857_v2 = vpop.permute.xlu1 %799 }
  0xd9   : > { %1008 = vrot.lane.b32.xlu1 %v995_v20, %s2382_s22  ;;  %v2880_v20 = vsel %vm719_vm4, %v2684_v22, %v2772_v35 }
  0xda   : > { %893 = vrot.lane.b32.xlu0 %v649_v10, %s2381_s21  ;;  %v2871_v44 = vpop.permute.xlu0 %759  ;;  %v2873_v29 = vpop.permute.xlu1 %801  ;;  %3798 = vst [vmem:[#allocation18_spill] sm:$0xff] %v2880_v20  ;;  %v741_v54 = vmul.bf16 %v2880_v20, %v2536_v8 }
  0xdb   : > { %3796 = vst [vmem:[#allocation16_spill] sm:$0xff] %v2871_v44  ;;  %3797 = vst [vmem:[#allocation17_spill] sm:$0xff] %v2873_v29 }
  0xdd   : > { %859 = vrot.lane.b32.xlu1 %v3763_v17, %s2377_s17  ;;  %v2898_v17 = vsel %vm627_vm3, %v2750_v7, %v2775_v41  ;;  %v2914_v7 = vsel %vm803_vm5, %v2713_v37, %v2782_v1 }
  0xde   : > { %938 = vrot.lane.b32.xlu0 %v924_v3, %s2380_s20  ;;  %v850_v50 = vpop.permute.xlu0 %849  ;;  %v852_v10 = vpop.permute.xlu1 %851  ;;  %v823_v37 = vmul.bf16 %v2914_v7, %v2511_v55 }
  0xdf   : > { %v867_v21 = vsel %vm865_vm6, %v850_v50, %v852_v10 }
  0xe0   : > { %v1132_v22 = vsel %vm1125_vm7, %v540_v60, %v867_v21  ;;  %v996_v60 = vrot.slane %v741_v54, 4 }
  0xe1   : > { %1044 = vrot.lane.b32.xlu1 %v782_v51, %s2372_s12  ;;  %1289 = vmatprep.subr.bf16.mxu0 %v1132_v22  ;;  %v3799_v51 = vrot.slane %v2515_v58, 4  ;;  %v541_v22 = vmul.bf16 %v2465_v23, %v2500_v49 }
  0xe2   : > { %965 = vrot.lane.b32.xlu0 %v2536_v8, %s2378_s18  ;;  %v848_v3 = vpop.permute.xlu0 %847  ;;  %v2902_v47 = vpop.permute.xlu1 %957 }
  0xe3   : > { %v866_v20 = vsel %vm865_vm6, %v848_v3, %v850_v50  ;;  %v650_v50 = vmul.bf16 %v2898_v17, %v2585_v39  ;;  %v2938_v3 = vsel %vm719_vm4, %v2772_v35, %v2786_v59  ;;  %v2952_v35 = vsel %vm761_vm1, %v2757_v19, %v2802_v0 }
  0xe4   : > { %v1128_v21 = vsel %vm1125_vm7, %v539_v24, %v866_v20  ;;  %v700_v24 = vmul.bf16 %v2908_v48, %v2585_v39  ;;  %v542_v20 = vmul.bf16 %v2527_v63, %v2511_v55  ;;  %3800 = vst [vmem:[#allocation19_spill] sm:$0xff] %v2952_v35  ;;  %v2971_v19 = vsel %vm677_vm2, %v2739_v53, %v2821_v6 }
  0xe5   : > { %1070 = vrot.lane.b32.xlu1 %v3799_v51, %s2379_s19  ;;  %1290 = vmatpush1.bf16.msra.mxu0 %v1128_v21  ;;  %3801 = vst [vmem:[#allocation20_spill] sm:$0xff] %v2971_v19  ;;  %vm1918_vm2 = vcmask 1045504  }
  0xe6   : > { %1010 = vrot.lane.b32.xlu0 %v996_v60, %s2382_s22  ;;  %v2922_v36 = vpop.permute.xlu0 %959  ;;  %v2924_v54 = vpop.permute.xlu1 %955  ;;  %v845_v60 = vrot.slane %v2582_v38, 4  ;;  %v925_v18 = vrot.slane %v700_v24, 4 }
  0xe9   : > { %895 = vrot.lane.b32.xlu1 %v650_v50, %s2381_s21 }
  0xea   : > { %1104 = vrot.lane.b32.xlu0 %v823_v37, %s2383_s23  ;;  %v2942_v21 = vpop.permute.xlu0 %855  ;;  %v854_v51 = vpop.permute.xlu1 %853  ;;  %v742_v37 = vmul.bf16 %v2938_v3, %v2585_v39 }
  0xeb   : > { %v869_v55 = vsel %vm865_vm6, %v854_v51, %v2942_v21  ;;  %v868_v49 = vsel %vm865_vm6, %v852_v10, %v854_v51  ;;  %v783_v10 = vmul.bf16 %v2952_v35, %v2536_v8  ;;  %v846_v51 = vrot.slane %v2588_v40, 4 }
  0xec   : > { %v1140_v50 = vsel %vm1125_vm7, %v542_v20, %v869_v55  ;;  %v1136_v63 = vsel %vm1125_vm7, %v541_v22, %v868_v49  ;;  %v997_v24 = vrot.slane %v742_v37, 4  ;;  %v3803_v20 = vrot.slane %v2536_v8, 4 }
  0xed   : > { %940 = vrot.lane.b32.xlu1 %v925_v18, %s2380_s20  ;;  %1330 = vmatprep.subr.bf16.mxu1 %v1140_v50  ;;  %v2966_v18 = vsel %vm803_vm5, %v2782_v1, %v2804_v43  ;;  %v701_v22 = vmul.bf16 %v2971_v19, %v2582_v38  ;;  %v2994_v55 = vsel %vm761_vm1, %v2802_v0, %v2823_v11 }
  0xee   : > { %861 = vrot.lane.b32.xlu0 %v845_v60, %s2377_s17  ;;  %1331 = vmatpush1.bf16.msra.mxu1 %v1136_v63  ;;  %v2977_v63 = vsel %vm627_vm3, %v2775_v41, %v2834_v52  ;;  %v824_v1 = vmul.bf16 %v2966_v18, %v2515_v58  ;;  %v2999_v49 = vsel %vm803_vm5, %v2804_v43, %v2855_v61  ;;  %vm2014_vm3 = vcmask 293888  }
  0xef   : > { %3802 = vst [vmem:[#allocation21_spill] sm:$0xff] %v2977_v63  ;;  %v651_v53 = vmul.bf16 %v2977_v63, %v2582_v38  ;;  %v926_v41 = vrot.slane %v701_v22, 4  ;;  %3804 = vst [vmem:[#allocation22_spill] sm:$0xff] %v2999_v49  ;;  %v784_v50 = vmul.bf16 %v2994_v55, %v2585_v39  ;;  %v825_v37 = vmul.bf16 %v2999_v49, %v2536_v8 }
  0xf0   : > { %v3010_v0 = vsel %vm719_vm4, %v2786_v59, %v2836_v32  ;;  %v652_v59 = vmul.bf16 %v2834_v52, %v2588_v40  ;;  %v3030_v22 = vsel %vm761_vm1, %v2823_v11, %v2871_v44 }
  0xf1   : > { %967 = vrot.lane.b32.xlu1 %v2585_v39, %s2378_s18  ;;  %3805 = vst [vmem:[#allocation23_spill] sm:$0xff] %v3010_v0  ;;  %v743_v43 = vmul.bf16 %v3010_v0, %v2582_v38  ;;  %3807 = vst [vmem:[#allocation24_spill] sm:$0xff] %v3030_v22 }
  0xf2   : > { %1046 = vrot.lane.b32.xlu0 %v783_v10, %s2372_s12  ;;  %v3806_v10 = vrot.slane %v2585_v39, 4 }
  0xf5   : > { %1012 = vrot.lane.b32.xlu1 %v997_v24, %s2382_s22  ;;  %v702_v24 = vmul.bf16 %v2821_v6, %v2588_v40 }
  0xf6   : > { %1072 = vrot.lane.b32.xlu0 %v3803_v20, %s2379_s19  ;;  %v998_v20 = vrot.slane %v743_v43, 4  ;;  %v3050_v43 = vsel %vm803_vm5, %v2857_v2, %v2873_v29 }
  0xf7   : > { %3809 = vst [vmem:[#allocation26_spill] sm:$0xff] %v3050_v43 }
  0xf9   : > { %1106 = vrot.lane.b32.xlu1 %v824_v1, %s2383_s23  ;;  %v3025_v1 = vpop.permute.xlu0 %1066 }
  0xfa   : > { %897 = vrot.lane.b32.xlu0 %v651_v53, %s2381_s21  ;;  %v927_v53 = vrot.slane %v702_v24, 4 }
  0xfd   : > { %863 = vrot.lane.b32.xlu1 %v846_v51, %s2377_s17 }
  0xfe   : > { %942 = vrot.lane.b32.xlu0 %v926_v41, %s2380_s20  ;;  %v785_v41 = vmul.bf16 %v3030_v22, %v2582_v38 }
 0x101   : > { %1048 = vrot.lane.b32.xlu1 %v784_v50, %s2372_s12  ;;  %v3039_v50 = vsel %vm803_vm5, %v2855_v61, %v2857_v2  ;;  %v744_v61 = vmul.bf16 %v2836_v32, %v2588_v40  ;;  %v1065_v2 = vpop.permute.xlu1 %1064 }
 0x102   : > { %1108 = vrot.lane.b32.xlu0 %v825_v37, %s2383_s23  ;;  %3808 = vst [vmem:[#allocation25_spill] sm:$0xff] %v3039_v50  ;;  %v3042_v37 = vpop.permute.xlu0 %1062  ;;  %v826_v11 = vmul.bf16 %v3039_v50, %v2585_v39 }
 0x105   : > { %1074 = vrot.lane.b32.xlu1 %v3806_v10, %s2379_s19  ;;  %v827_v10 = vmul.bf16 %v3050_v43, %v2582_v38 }
 0x106   : > { %969 = vrot.lane.b32.xlu0 %v2582_v38, %s2378_s18  ;;  %v929_v24 = vpop.permute.xlu0 %928 }
 0x109   : > { %899 = vrot.lane.b32.xlu1 %v652_v59, %s2381_s21  ;;  %v999_v59 = vrot.slane %v744_v61, 4  ;;  %v828_v61 = vmul.bf16 %v2873_v29, %v2588_v40 }
 0x10a   : > { %1014 = vrot.lane.b32.xlu0 %v998_v20, %s2382_s22 }
 0x10d   : > { %944 = vrot.lane.b32.xlu1 %v927_v53, %s2380_s20  ;;  %v1255_v53 = vld [vmem:[%s3747_s3] sm:$0xf] }
 0x10e   : > { %1050 = vrot.lane.b32.xlu0 %v785_v41, %s2372_s12 }
 0x111   : > { %1110 = vrot.lane.b32.xlu1 %v826_v11, %s2383_s23  ;;  %v1037_v11 = vpop.permute.xlu1 %1036 }
 0x112   : > { %1076 = vrot.lane.b32.xlu0 %v845_v60, %s2379_s19  ;;  %v786_v60 = vmul.bf16 %v2871_v44, %v2588_v40 }
 0x115   : > { %971 = vrot.lane.b32.xlu1 %v2588_v40, %s2378_s18 }
 0x116   : > { %1112 = vrot.lane.b32.xlu0 %v827_v10, %s2383_s23  ;;  %v884_v10 = vpop.permute.xlu1 %883 }
 0x118   : > { %v3061_v20 = vpop.permute.xlu0 %1040 }
 0x119   : > { %1016 = vrot.lane.b32.xlu1 %v999_v59, %s2382_s22 }
 0x11a   : > { %1258 = vperm.xlu0 %2355, %v1255_v53  }
 0x11c   : > { %v1001_v41 = vpop.permute.xlu0 %1000 }
 0x11d   : > { %1052 = vrot.lane.b32.xlu1 %v786_v60, %s2372_s12 }
 0x120   : > { %v888_v23 = vpop.permute.xlu0 %887 }
 0x121   : > { %1078 = vrot.lane.b32.xlu1 %v846_v51, %s2379_s19 }
 0x124   : > { %v933_v59 = vpop.permute.xlu0 %932 }
 0x125   : > { %1114 = vrot.lane.b32.xlu1 %v828_v61, %s2383_s23 }
 0x127   : > { %v1099_v43 = vpop.permute.xlu1 %1098 }
 0x128   : > { %v1101_v49 = vpop.permute.xlu0 %1100 }
 0x12b   : > { %v1039_v50 = vpop.permute.xlu1 %1038 }
 0x12c   : > { %v1005_v22 = vpop.permute.xlu0 %1004  ;;  %v1054_v52 = vsel %vm761_vm1, %v1037_v11, %v1039_v50 }
 0x12f   : > { %v886_v0 = vpop.permute.xlu1 %885 }
 0x130   : > { %v3074_v44 = vpop.permute.xlu0 %891  ;;  %v902_v53 = vsel %vm901_vm8, %v884_v10, %v886_v0  ;;  %v903_v51 = vsel %vm901_vm8, %v886_v0, %v888_v23  ;;  %v975_v0 = vsel %vm973_vm10, %v2902_v47, %v2922_v36  ;;  %v974_v10 = vsel %vm973_vm10, %v2924_v54, %v2902_v47 }
 0x133   : > { %v931_v60 = vpop.permute.xlu1 %930 }
 0x134   : > { %v947_v40 = vsel %vm946_vm9, %v929_v24, %v931_v60  ;;  %v948_v29 = vsel %vm946_vm9, %v931_v60, %v933_v59  ;;  %v3080_v19 = vpop.permute.xlu0 %936 }
 0x135   : > { %v1164_v61 = vsel %vm1125_vm7, %v903_v51, %v948_v29  ;;  %v1160_v32 = vsel %vm1125_vm7, %v902_v53, %v947_v40  ;;  %v1055_v29 = vsel %vm761_vm1, %v1039_v50, %v3061_v20 }
 0x136   : > { %1291 = vmatprep.subr.bf16.mxu0 %v1164_v61  ;;  %v1082_v61 = vsel %vm1080_vm12, %v1065_v2, %v3025_v1 }
 0x137   : > { %1292 = vmatpush1.bf16.msra.mxu0 %v1160_v32  ;;  %v3084_v63 = vpop.permute.xlu1 %1102  ;;  %v1228_v54 = vsel %vm1125_vm7, %v1055_v29, %v1082_v61  ;;  %v3810_v61 = vmov 0  }
 0x138   : > { %v962_v6 = vpop.permute.xlu0 %961 }
 0x13b   : > { %v1003_v24 = vpop.permute.xlu1 %1002 }
 0x13c   : > { %v1019_v32 = vsel %vm1018_vm11, %v1001_v41, %v1003_v24  ;;  %v1020_v60 = vsel %vm1018_vm11, %v1003_v24, %v1005_v22  ;;  %v1007_v53 = vpop.permute.xlu0 %1006  ;;  %v1081_v41 = vsel %vm1080_vm12, %v3042_v37, %v1065_v2 }
 0x13d   : > { %v1196_v51 = vsel %vm1125_vm7, %v975_v0, %v1020_v60  ;;  %v1192_v40 = vsel %vm1125_vm7, %v974_v10, %v1019_v32  ;;  %v1224_v0 = vsel %vm1125_vm7, %v1054_v52, %v1081_v41  ;;  %v1118_v10 = vsel %vm1116_vm13, %v1101_v49, %v3084_v63 }
 0x13e   : > { %1293 = vmatprep.subr.bf16.mxu0 %v1196_v51  ;;  %v1117_v32 = vsel %vm1116_vm13, %v1099_v43, %v1101_v49  ;;  %v3121_v43 = vld [vmem:[%s3746_s2] sm:$0x3]  ;;  %v1021_v51 = vsel %vm1018_vm11, %v1005_v22, %v1007_v53  ;;  %v543_v22 = vmul.bf16 %v2520_v62, %v2515_v58 }
 0x13f   : > { %1294 = vmatpush1.bf16.msra.mxu0 %v1192_v40  ;;  %v890_v47 = vpop.permute.xlu1 %889  ;;  %v1266_v49 = vsel %vm1125_vm7, %v1117_v32, 0 }
 0x140   : > { %1295 = vmatprep.subr.bf16.mxu0 %v1228_v54  ;;  %v858_v35 = vpop.permute.xlu0 %857  ;;  %v904_v50 = vsel %vm901_vm8, %v888_v23, %v890_v47  ;;  %v905_v11 = vsel %vm901_vm8, %v890_v47, %v3074_v44 }
 0x143   : > { %1296 = vmatpush1.bf16.msra.mxu0 %v1224_v0  ;;  %v935_v24 = vpop.permute.xlu1 %934  ;;  %v976_v0 = vsel %vm973_vm10, %v2922_v36, %v962_v6 }
 0x144   : > { %v949_v29 = vsel %vm946_vm9, %v933_v59, %v935_v24  ;;  %v950_v60 = vsel %vm946_vm9, %v935_v24, %v3080_v19  ;;  %2311 = vmatprep.subr.msk.bf16.mxu0 %vm1125_vm7, %v1118_v10  ;;  %v1043_v52 = vpop.permute.xlu0 %1042  ;;  %v544_v10 = vmul.bf16 %v2546_v13, %v2536_v8  ;;  %v1200_v32 = vsel %vm1125_vm7, %v976_v0, %v1021_v51 }
 0x145   : > { %v1172_v37 = vsel %vm1125_vm7, %v905_v11, %v950_v60  ;;  %v1168_v2 = vsel %vm1125_vm7, %v904_v50, %v949_v29  ;;  %v870_v50 = vsel %vm865_vm6, %v2942_v21, %v858_v35 }
 0x146   : > { %1332 = vmatprep.subr.bf16.mxu1 %v1172_v37  ;;  %v1144_v36 = vsel %vm1125_vm7, %v543_v22, %v870_v50 }
 0x147   : > { %1298 = vmatpush1.bf16.msra.mxu0 %v1266_v49  ;;  %v964_v23 = vpop.permute.xlu1 %963  ;;  %1333 = vmatpush1.bf16.msra.mxu1 %v1168_v2 }
 0x148   : > { %v1069_v59 = vpop.permute.xlu0 %1068  ;;  %v977_v47 = vsel %vm973_vm10, %v962_v6, %v964_v23 }
 0x149   : > { %v1083_v37 = vsel %vm1080_vm12, %v3025_v1, %v1069_v59 }
 0x14a   : > { %2312 = vmatmul.mubr.msk.bf16.vlgmr.msra.gmra.mrb[0].mxu0 %vm1261_vm14, %v3121_v43 }
 0x14b   : > { %v1009_v40 = vpop.permute.xlu1 %1008  ;;  %1403 = vmatprep.mubr.bf16.mxu0 %v3810_v61 }
 0x14c   : > { %v1022_v54 = vsel %vm1018_vm11, %v1007_v53, %v1009_v40  ;;  %v894_v41 = vpop.permute.xlu0 %893 }
 0x14d   : > { %v1204_v24 = vsel %vm1125_vm7, %v977_v47, %v1022_v54 }
 0x14e   : > { %1334 = vmatprep.subr.bf16.mxu1 %v1204_v24 }
 0x14f   : > { %v860_v11 = vpop.permute.xlu1 %859  ;;  %1335 = vmatpush1.bf16.msra.mxu1 %v1200_v32 }
 0x150   : > { %v871_v53 = vsel %vm865_vm6, %v858_v35, %v860_v11  ;;  %v939_v29 = vpop.permute.xlu0 %938  ;;  %v1056_v35 = vsel %vm761_vm1, %v3061_v20, %v1043_v52  ;;  %v906_v20 = vsel %vm901_vm8, %v3074_v44, %v894_v41 }
 0x151   : > { %v1148_v6 = vsel %vm1125_vm7, %v544_v10, %v871_v53  ;;  %v1232_v47 = vsel %vm1125_vm7, %v1056_v35, %v1083_v37  ;;  %v951_v1 = vsel %vm946_vm9, %v3080_v19, %v939_v29 }
 0x152   : > { %1371 = vmatprep.subr.bf16.mxu0 %v1148_v6  ;;  %v1176_v22 = vsel %vm1125_vm7, %v906_v20, %v951_v1 }
 0x153   : > { %1372 = vmatpush1.bf16.msra.mxu0 %v1144_v36  ;;  %v1045_v8 = vpop.permute.xlu1 %1044 }
 0x154   : > { %v966_v60 = vpop.permute.xlu0 %965  ;;  %v1057_v2 = vsel %vm761_vm1, %v1043_v52, %v1045_v8 }
 0x157   : > { %v1071_v58 = vpop.permute.xlu1 %1070 }
 0x158   : > { %v1084_v21 = vsel %vm1080_vm12, %v1069_v59, %v1071_v58  ;;  %v1011_v49 = vpop.permute.xlu0 %1010 }
 0x159   : > { %v1236_v51 = vsel %vm1125_vm7, %v1057_v2, %v1084_v21  ;;  %v1023_v19 = vsel %vm1018_vm11, %v1009_v40, %v1011_v49 }
 0x15a   : > { %1336 = vmatprep.subr.bf16.mxu1 %v1236_v51 }
 0x15b   : > { %v896_v54 = vpop.permute.xlu1 %895  ;;  %1337 = vmatpush1.bf16.msra.mxu1 %v1232_v47 }
 0x15c   : > { %v1105_v0 = vpop.permute.xlu0 %1104  ;;  %v907_v10 = vsel %vm901_vm8, %v894_v41, %v896_v54  ;;  %v978_v41 = vsel %vm973_vm10, %v964_v23, %v966_v60  ;;  %v546_v23 = vmul.bf16 %v2573_v31, %v2582_v38 }
 0x15d   : > { %v1208_v2 = vsel %vm1125_vm7, %v978_v41, %v1023_v19  ;;  %v1119_v21 = vsel %vm1116_vm13, %v3084_v63, %v1105_v0 }
 0x15f   : > { %v941_v24 = vpop.permute.xlu1 %940 }
 0x160   : > { %v952_v59 = vsel %vm946_vm9, %v939_v29, %v941_v24  ;;  %v862_v32 = vpop.permute.xlu0 %861 }
 0x161   : > { %v1180_v52 = vsel %vm1125_vm7, %v907_v10, %v952_v59  ;;  %v872_v47 = vsel %vm865_vm6, %v860_v11, %v862_v32 }
 0x162   : > { %1373 = vmatprep.subr.bf16.mxu0 %v1180_v52 }
 0x163   : > { %1374 = vmatpush1.bf16.msra.mxu0 %v1176_v22  ;;  %v3158_v50 = vpop.permute.xlu1 %967 }
 0x164   : > { %v1047_v53 = vpop.permute.xlu0 %1046  ;;  %v979_v29 = vsel %vm973_vm10, %v966_v60, %v3158_v50  ;;  %v545_v60 = vmul.bf16 %v2552_v16, %v2585_v39 }
 0x165   : > { %v1058_v22 = vsel %vm761_vm1, %v1045_v8, %v1047_v53 }
 0x166   : > { %v1152_v59 = vsel %vm1125_vm7, %v545_v60, %v872_v47 }
 0x167   : > { %v3161_v6 = vpop.permute.xlu1 %1012 }
 0x168   : > { %v1024_v36 = vsel %vm1018_vm11, %v1011_v49, %v3161_v6  ;;  %v1073_v44 = vpop.permute.xlu0 %1072  ;;  %v1272_v49 = vsel %vm1125_vm7, %v1119_v21, 0 }
 0x169   : > { %v1212_v37 = vsel %vm1125_vm7, %v979_v29, %v1024_v36  ;;  %v1085_v39 = vsel %vm1080_vm12, %v1071_v58, %v1073_v44 }
 0x16a   : > { %1375 = vmatprep.subr.bf16.mxu0 %v1212_v37  ;;  %v1240_v29 = vsel %vm1125_vm7, %v1058_v22, %v1085_v39 }
 0x16b   : > { %1376 = vmatpush1.bf16.msra.mxu0 %v1208_v2  ;;  %v1107_v40 = vpop.permute.xlu1 %1106 }
 0x16c   : > { %v898_v35 = vpop.permute.xlu0 %897  ;;  %v1120_v51 = vsel %vm1116_vm13, %v1105_v0, %v1107_v40 }
 0x16d   : > { %2313 = vmatprep.subr.msk.bf16.mxu1 %vm1125_vm7, %v1120_v51  ;;  %v908_v51 = vsel %vm901_vm8, %v896_v54, %v898_v35 }
 0x16e   : > { %1339 = vmatpush1.bf16.msra.mxu1 %v1272_v49 }
 0x16f   : > { %v864_v1 = vpop.permute.xlu1 %863 }
 0x170   : > { %v873_v63 = vsel %vm865_vm6, %v862_v32, %v864_v1  ;;  %v943_v10 = vpop.permute.xlu0 %942 }
 0x171   : > { %2314 = vmatmul.mubr.msk.bf16.vlgmr.msra.gmra.mrb[0].mxu1 %vm1261_vm14, %v3121_v43  ;;  %v1156_v0 = vsel %vm1125_vm7, %v546_v23, %v873_v63  ;;  %v953_v37 = vsel %vm946_vm9, %v941_v24, %v943_v10 }
 0x172   : > { %1412 = vmatprep.subr.bf16.mxu1 %v1156_v0  ;;  %1444 = vmatprep.mubr.bf16.mxu1 %v3810_v61  ;;  %v1184_v49 = vsel %vm1125_vm7, %v908_v51, %v953_v37 }
 0x173   : > { %v1049_v38 = vpop.permute.xlu1 %1048  ;;  %1413 = vmatpush1.bf16.msra.mxu1 %v1152_v59 }
 0x174   : > { %v1109_v20 = vpop.permute.xlu0 %1108  ;;  %v1059_v52 = vsel %vm761_vm1, %v1047_v53, %v1049_v38 }
 0x175   : > { %v1121_v8 = vsel %vm1116_vm13, %v1107_v40, %v1109_v20 }
 0x176   : > { %v1278_v24 = vsel %vm1125_vm7, %v1121_v8, 0 }
 0x177   : > { %v1075_v11 = vpop.permute.xlu1 %1074 }
 0x178   : > { %v1086_v32 = vsel %vm1080_vm12, %v1073_v44, %v1075_v11  ;;  %v970_v41 = vpop.permute.xlu0 %969 }
 0x179   : > { %v1244_v19 = vsel %vm1125_vm7, %v1059_v52, %v1086_v32 }
 0x17a   : > { %1377 = vmatprep.subr.bf16.mxu0 %v1244_v19 }
 0x17b   : > { %1378 = vmatpush1.bf16.msra.mxu0 %v1240_v29  ;;  %v900_v36 = vpop.permute.xlu1 %899 }
 0x17c   : > { %v909_v58 = vsel %vm901_vm8, %v898_v35, %v900_v36  ;;  %v1015_v53 = vpop.permute.xlu0 %1014 }
 0x17d   : > { %v1025_v40 = vsel %vm1018_vm11, %v3161_v6, %v1015_v53 }
 0x17f   : > { %v945_v2 = vpop.permute.xlu1 %944 }
 0x180   : > { %v954_v21 = vsel %vm946_vm9, %v943_v10, %v945_v2  ;;  %v1051_v1 = vpop.permute.xlu0 %1050  ;;  %v980_v10 = vsel %vm973_vm10, %v3158_v50, %v970_v41 }
 0x181   : > { %v1188_v44 = vsel %vm1125_vm7, %v909_v58, %v954_v21  ;;  %v1060_v29 = vsel %vm761_vm1, %v1049_v38, %v1051_v1 }
 0x182   : > { %1414 = vmatprep.subr.bf16.mxu1 %v1188_v44 }
 0x183   : > { %v1111_v23 = vpop.permute.xlu1 %1110  ;;  %1415 = vmatpush1.bf16.msra.mxu1 %v1184_v49 }
 0x184   : > { %v1122_v60 = vsel %vm1116_vm13, %v1109_v20, %v1111_v23  ;;  %v1077_v59 = vpop.permute.xlu0 %1076  ;;  %v1216_v20 = vsel %vm1125_vm7, %v980_v10, %v1025_v40 }
 0x185   : > { %2315 = vmatprep.subr.msk.bf16.mxu0 %vm1125_vm7, %v1122_v60  ;;  %v1087_v52 = vsel %vm1080_vm12, %v1075_v11, %v1077_v59 }
 0x186   : > { %1380 = vmatpush1.bf16.msra.mxu0 %v1278_v24  ;;  %v1248_v36 = vsel %vm1125_vm7, %v1060_v29, %v1087_v52 }
 0x187   : > { %v972_v47 = vpop.permute.xlu1 %971 }
 0x188   : > { %v981_v54 = vsel %vm973_vm10, %v970_v41, %v972_v47  ;;  %v1113_v22 = vpop.permute.xlu0 %1112 }
 0x189   : > { %2316 = vmatmul.mubr.msk.bf16.vlgmr.msra.gmra.mrb[4].mxu0 %vm1261_vm14, %v3121_v43  ;;  %v1123_v41 = vsel %vm1116_vm13, %v1111_v23, %v1113_v22 }
 0x18a   : > { %2074 = vmatprep.mubr.bf16.mxu0 %v3810_v61  ;;  %v1284_v11 = vsel %vm1125_vm7, %v1123_v41, 0 }
 0x18b   : > { %v1017_v35 = vpop.permute.xlu1 %1016 }
 0x18c   : > { %v1026_v63 = vsel %vm1018_vm11, %v1015_v53, %v1017_v35 }
 0x18d   : > { %v1220_v0 = vsel %vm1125_vm7, %v981_v54, %v1026_v63 }
 0x18e   : > { %1416 = vmatprep.subr.bf16.mxu1 %v1220_v0 }
 0x18f   : > { %v1053_v39 = vpop.permute.xlu1 %1052  ;;  %1417 = vmatpush1.bf16.msra.mxu1 %v1216_v20 }
 0x190   : > { %v1061_v6 = vsel %vm761_vm1, %v1051_v1, %v1053_v39 }
 0x193   : > { %v1079_v32 = vpop.permute.xlu1 %1078 }
 0x194   : > { %v1088_v19 = vsel %vm1080_vm12, %v1077_v59, %v1079_v32 }
 0x195   : > { %v1252_v50 = vsel %vm1125_vm7, %v1061_v6, %v1088_v19 }
 0x196   : > { %1418 = vmatprep.subr.bf16.mxu1 %v1252_v50 }
 0x197   : > { %v1115_v37 = vpop.permute.xlu1 %1114  ;;  %1419 = vmatpush1.bf16.msra.mxu1 %v1248_v36 }
 0x198   : > { %v1124_v2 = vsel %vm1116_vm13, %v1113_v22, %v1115_v37 }
 0x199   : > { %2317 = vmatprep.subr.msk.bf16.mxu1 %vm1125_vm7, %v1124_v2  ;;  %v1259_v38 = vpop.permute.xlu0 %1258 }
 0x19b   : > { %1421 = vmatpush1.bf16.msra.mxu1 %v1284_v11 }
 0x19e   : > { %2318 = vmatmul.mubr.msk.bf16.vlgmr.msra.gmra.mrb[4].mxu1 %vm1261_vm14, %v3121_v43 }
 0x19f   : > { %2115 = vmatprep.mubr.bf16.mxu1 %v3810_v61 }
 0x21d   : > { %v1323_v58 = vpop.f32.mrb[0].mxu0 }
 0x21e   : > { %v1325_v21 = vpop.f32.mrb[1].mxu0  ;;  %v1324_v51 = vadd.f32 %v1323_v58, %v1259_v38 }
 0x21f   : > { %v1326_v44 = vadd.f32 %v1325_v21, %v1259_v38  ;;  %v1327_v8 = vpop.f32.mrb[2].mxu0 }
 0x220   : > { %v1453_v53 = vmax.f32 %v1324_v51, 0.0  ;;  %v1328_v49 = vpop.f32.mrb[3].mxu0 }
 0x221   : > { %v1454_v23 = vmax.f32 %v1326_v44, 0.0 }
 0x222   : > { %v1461_v60 = vpack.c.bf16 %v1453_v53, %v1453_v53 }
 0x223   : > { %v1462_v24 = vpack.c.bf16 %v1454_v23, %v1454_v23 }
 0x224   : > { %1477 = vrot.lane.b32.xlu1 %v1461_v60, %s2385_s30 }
 0x228   : > { %1479 = vrot.lane.b32.xlu1 %v1462_v24, %s2385_s30 }
 0x244   : > { %v1364_v47 = vpop.f32.mrb[0].mxu1 }
 0x245   : > { %v1365_v43 = vadd.f32 %v1364_v47, %v1259_v38  ;;  %v1366_v1 = vpop.f32.mrb[1].mxu1 }
 0x246   : > { %v1367_v54 = vadd.f32 %v1366_v1, %v1259_v38  ;;  %v1368_v40 = vpop.f32.mrb[2].mxu1 }
 0x247   : > { %v1455_v35 = vmax.f32 %v1365_v43, 0.0  ;;  %v1369_v63 = vpop.f32.mrb[3].mxu1 }
 0x248   : > { %v1456_v10 = vmax.f32 %v1367_v54, 0.0 }
 0x249   : > { %v1463_v0 = vpack.c.bf16 %v1455_v35, %v1455_v35 }
 0x24a   : > { %v1464_v59 = vpack.c.bf16 %v1456_v10, %v1456_v10 }
 0x24b   : > { %1481 = vrot.lane.b32.xlu0 %v1463_v0, %s2385_s30 }
 0x24c   : > { %1483 = vrot.lane.b32.xlu1 %v1464_v59, %s2385_s30 }
 0x25c   : > { %v1405_v20 = vpop.f32.mrb[4].mxu0 }
 0x25d   : > { %v1406_v39 = vadd.f32 %v1405_v20, %v1259_v38  ;;  %v1407_v52 = vpop.f32.mrb[5].mxu0 }
 0x25e   : > { %v1408_v32 = vadd.f32 %v1407_v52, %v1259_v38  ;;  %v1409_v22 = vpop.f32.mrb[6].mxu0 }
 0x25f   : > { %v1457_v6 = vmax.f32 %v1406_v39, 0.0  ;;  %v1410_v19 = vpop.f32.mrb[7].mxu0 }
 0x260   : > { %v1458_v29 = vmax.f32 %v1408_v32, 0.0 }
 0x261   : > { %v1465_v50 = vpack.c.bf16 %v1457_v6, %v1457_v6 }
 0x262   : > { %v1466_v36 = vpack.c.bf16 %v1458_v29, %v1458_v29 }
 0x263   : > { %1485 = vrot.lane.b32.xlu0 %v1465_v50, %s2385_s30 }
 0x264   : > { %1487 = vrot.lane.b32.xlu1 %v1466_v36, %s2385_s30 }
 0x271   : > { %v1446_v41 = vpop.f32.mrb[4].mxu1 }
 0x272   : > { %v1447_v37 = vadd.f32 %v1446_v41, %v1259_v38  ;;  %v1448_v2 = vpop.f32.mrb[5].mxu1 }
 0x273   : > { %v1449_v11 = vadd.f32 %v1448_v2, %v1259_v38  ;;  %v1450_v58 = vpop.f32.mrb[6].mxu1 }
 0x274   : > { %v1459_v21 = vmax.f32 %v1447_v37, 0.0  ;;  %v1451_v51 = vpop.f32.mrb[7].mxu1 }
 0x275   : > { %v1460_v44 = vmax.f32 %v1449_v11, 0.0 }
 0x276   : > { %v1467_v8 = vpack.c.bf16 %v1459_v21, %v1459_v21 }
 0x277   : > { %v1468_v53 = vpack.c.bf16 %v1460_v44, %v1460_v44 }
 0x278   : > { %1489 = vrot.lane.b32.xlu0 %v1467_v8, %s2385_s30 }
 0x279   : > { %1491 = vrot.lane.b32.xlu1 %v1468_v53, %s2385_s30 }
 0x296   : > { %v1478_v49 = vpop.permute.xlu1 %1477 }
 0x297   : > { %v3235_v23 = vsel %vm1493_vm15, 0, %v1478_v49 }
 0x298   : > { %1694 = vrot.lane.b32.xlu1 %v3235_v23, %s2378_s18  ;;  %v1571_v38 = vrot.slane %v3235_v23, 6  ;;  %v1560_v47 = vmul.bf16 %v3235_v23, %v2692_v28  ;;  %v1808_v28 = vrot.slane %v3235_v23, 2  ;;  %v1524_v63 = vmul.bf16 %v3235_v23, %v2637_v56 }
 0x299   : > { %v1551_v59 = vmul.bf16 %v3235_v23, %v2625_v45  ;;  %v1533_v52 = vmul.bf16 %v3235_v23, %v2627_v46  ;;  %v1542_v22 = vmul.bf16 %v3235_v23, %v2639_v57 }
 0x29a   : > { %v1480_v60 = vpop.permute.xlu1 %1479  ;;  %1580 = vrot.lane.b32.xlu0 %v1571_v38, %s2377_s17  ;;  %v1615_v0 = vrot.slane %v1524_v63, 4 }
 0x29b   : > { %v3242_v24 = vsel %vm1493_vm15, %v1478_v49, %v1480_v60  ;;  %v1773_v39 = vrot.slane %v1551_v59, 4  ;;  %v1659_v45 = vrot.slane %v1533_v52, 2  ;;  %v1729_v46 = vrot.slane %v1542_v22, 6  ;;  %v3813_v52 = vld [vmem:[#allocation7_spill] sm:$0xff] }
 0x29c   : > { %1696 = vrot.lane.b32.xlu1 %v3242_v24, %s2378_s18  ;;  %v1572_v10 = vrot.slane %v3242_v24, 6  ;;  %v1809_v20 = vrot.slane %v3242_v24, 2  ;;  %v1561_v56 = vmul.bf16 %v3242_v24, %v2697_v30  ;;  %v1525_v19 = vmul.bf16 %v3242_v24, %v2723_v42 }
 0x29d   : > { %v1543_v29 = vmul.bf16 %v3242_v24, %v2762_v25  ;;  %v1552_v42 = vmul.bf16 %v3242_v24, %v2703_v33 }
 0x29e   : > { %v1616_v30 = vrot.slane %v1525_v19, 4 }
 0x29f   : > { %v1730_v50 = vrot.slane %v1543_v29, 6  ;;  %v1774_v41 = vrot.slane %v1552_v42, 4  ;;  %v3815_v29 = vld [vmem:[#allocation15_spill] sm:$0xff] }
 0x2a0   : > { %1852 = vrot.lane.b32.xlu1 %v1560_v47, %s2383_s23 }
 0x2bd   : > { %v1482_v43 = vpop.permute.xlu0 %1481 }
 0x2be   : > { %v3250_v1 = vsel %vm1493_vm15, %v1480_v60, %v1482_v43  ;;  %v3252_v54 = vpop.permute.xlu1 %1483 }
 0x2bf   : > { %v3256_v40 = vsel %vm1493_vm15, %v1482_v43, %v3252_v54  ;;  %1698 = vrot.lane.b32.xlu0 %v3250_v1, %s2378_s18  ;;  %v1573_v35 = vrot.slane %v3250_v1, 6  ;;  %v1810_v32 = vrot.slane %v3250_v1, 2  ;;  %v1562_v6 = vmul.bf16 %v3250_v1, %v2755_v12 }
 0x2c0   : > { %1700 = vrot.lane.b32.xlu1 %v3256_v40, %s2378_s18  ;;  %v1574_v57 = vrot.slane %v3256_v40, 6  ;;  %v1534_v12 = vmul.bf16 %v3242_v24, %v2719_v26  ;;  %v1535_v25 = vmul.bf16 %v3250_v1, %v2667_v14  ;;  %v1811_v37 = vrot.slane %v3256_v40, 2 }
 0x2c1   : > { %v1527_v2 = vmul.bf16 %v3256_v40, %v2796_v5  ;;  %v1563_v33 = vmul.bf16 %v3256_v40, %v2914_v7  ;;  %v1526_v14 = vmul.bf16 %v3250_v1, %v2671_v15  ;;  %v1545_v58 = vmul.bf16 %v3256_v40, %v2767_v34 }
 0x2c2   : > { %v1660_v36 = vrot.slane %v1534_v12, 2  ;;  %v1661_v26 = vrot.slane %v1535_v25, 2  ;;  %v1544_v5 = vmul.bf16 %v3250_v1, %v2690_v27  ;;  %v1554_v44 = vmul.bf16 %v3256_v40, %v2815_v9  ;;  %v3811_v9 = vld [vmem:[#allocation8_spill] sm:$0xff]  ;;  %v3816_v25 = vld [vmem:[#allocation14_spill] sm:$0xff] }
 0x2c3   : > { %1817 = vrot.lane.b32.xlu0 %v1808_v28, %s2379_s19  ;;  %v1618_v11 = vrot.slane %v1527_v2, 4  ;;  %v1617_v21 = vrot.slane %v1526_v14, 4  ;;  %v1732_v51 = vrot.slane %v1545_v58, 6  ;;  %v1553_v34 = vmul.bf16 %v3250_v1, %v2654_v4  ;;  %v3817_v14 = vld [vmem:[#allocation13_spill] sm:$0xff] }
 0x2c4   : > { %1584 = vrot.lane.b32.xlu1 %v1573_v35, %s2377_s17  ;;  %v1731_v15 = vrot.slane %v1544_v5, 6  ;;  %v1776_v8 = vrot.slane %v1554_v44, 4  ;;  %v1536_v49 = vmul.bf16 %v3256_v40, %v3811_v9  ;;  %v3818_v5 = vld [vmem:[#allocation18_spill] sm:$0xff] }
 0x2c5   : > { %v1775_v27 = vrot.slane %v1553_v34, 4 }
 0x2c6   : > { %v1662_v4 = vrot.slane %v1536_v49, 2 }
 0x2c7   : > { %1582 = vrot.lane.b32.xlu0 %v1572_v10, %s2377_s17  ;;  %v3812_v10 = vld [vmem:[#allocation6_spill] sm:$0xff] }
 0x2c8   : > { %1624 = vrot.lane.b32.xlu1 %v1615_v0, %s2381_s21 }
 0x2cb   : > { %1819 = vrot.lane.b32.xlu0 %v1809_v20, %s2379_s19 }
 0x2cc   : > { %1782 = vrot.lane.b32.xlu1 %v1773_v39, %s2372_s12 }
 0x2cf   : > { %1854 = vrot.lane.b32.xlu0 %v1561_v56, %s2383_s23 }
 0x2d0   : > { %1821 = vrot.lane.b32.xlu1 %v1810_v32, %s2379_s19 }
 0x2d3   : > { %1668 = vrot.lane.b32.xlu0 %v1659_v45, %s2380_s20 }
 0x2d4   : > { %1856 = vrot.lane.b32.xlu1 %v1562_v6, %s2383_s23  ;;  %v3814_v6 = vld [vmem:[#allocation10_spill] sm:$0xff] }
 0x2d5   : > { %v1486_v7 = vpop.permute.xlu0 %1485 }
 0x2d6   : > { %v3329_v53 = vsel %vm1493_vm15, %v3252_v54, %v1486_v7  ;;  %v1488_v43 = vpop.permute.xlu1 %1487 }
 0x2d7   : > { %1738 = vrot.lane.b32.xlu0 %v1729_v46, %s2382_s22  ;;  %v1575_v38 = vrot.slane %v3329_v53, 6  ;;  %v1812_v60 = vrot.slane %v3329_v53, 2  ;;  %v1564_v47 = vmul.bf16 %v3329_v53, %v2966_v18  ;;  %v3347_v28 = vsel %vm1493_vm15, %v1486_v7, %v1488_v43 }
 0x2d8   : > { %1626 = vrot.lane.b32.xlu1 %v1616_v30, %s2381_s21  ;;  %v1576_v18 = vrot.slane %v3347_v28, 6  ;;  %v1537_v0 = vmul.bf16 %v3329_v53, %v3812_v10  ;;  %v1813_v56 = vrot.slane %v3347_v28, 2  ;;  %v1528_v32 = vmul.bf16 %v3329_v53, %v3813_v52 }
 0x2d9   : > { %v1546_v19 = vmul.bf16 %v3329_v53, %v3814_v6 }
 0x2da   : > { %v1663_v39 = vrot.slane %v1537_v0, 2  ;;  %v1619_v22 = vrot.slane %v1528_v32, 4  ;;  %v3823_v0 = vld [vmem:[#allocation12_spill] sm:$0xff] }
 0x2db   : > { %1586 = vrot.lane.b32.xlu0 %v1574_v57, %s2377_s17  ;;  %v1733_v30 = vrot.slane %v1546_v19, 6  ;;  %v1555_v57 = vmul.bf16 %v3329_v53, %v3815_v29  ;;  %v3824_v32 = vld [vmem:[#allocation20_spill] sm:$0xff] }
 0x2dc   : > { %1740 = vrot.lane.b32.xlu1 %v1730_v50, %s2382_s22  ;;  %v3825_v19 = vld [vmem:[#allocation16_spill] sm:$0xff] }
 0x2dd   : > { %v1777_v50 = vrot.slane %v1555_v57, 4 }
 0x2df   : > { %1670 = vrot.lane.b32.xlu0 %v1660_v36, %s2380_s20 }
 0x2e0   : > { %1784 = vrot.lane.b32.xlu1 %v1774_v41, %s2372_s12 }
 0x2e3   : > { %1823 = vrot.lane.b32.xlu0 %v1811_v37, %s2379_s19  ;;  %v1529_v37 = vmul.bf16 %v3347_v28, %v3816_v25 }
 0x2e4   : > { %1672 = vrot.lane.b32.xlu1 %v1661_v26, %s2380_s20 }
 0x2e7   : > { %1858 = vrot.lane.b32.xlu0 %v1563_v33, %s2383_s23  ;;  %v1620_v33 = vrot.slane %v1529_v37, 4  ;;  %v3827_v37 = vld [vmem:[#allocation24_spill] sm:$0xff] }
 0x2e8   : > { %1630 = vrot.lane.b32.xlu1 %v1618_v11, %s2381_s21 }
 0x2ea   : > { %v1490_v54 = vpop.permute.xlu0 %1489 }
 0x2eb   : > { %1628 = vrot.lane.b32.xlu0 %v1617_v21, %s2381_s21  ;;  %v3350_v35 = vsel %vm1493_vm15, %v1488_v43, %v1490_v54  ;;  %v1492_v63 = vpop.permute.xlu1 %1491 }
 0x2ec   : > { %1744 = vrot.lane.b32.xlu1 %v1732_v51, %s2382_s22  ;;  %v3360_v59 = vsel %vm1493_vm15, %v1492_v63, 0  ;;  %v3366_v20 = vsel %vm1493_vm15, %v1490_v54, %v1492_v63  ;;  %v1577_v45 = vrot.slane %v3350_v35, 6  ;;  %v1814_v46 = vrot.slane %v3350_v35, 2  ;;  %v3822_v54 = vld [vmem:[#allocation21_spill] sm:$0xff] }
 0x2ed   : > { %v1579_v12 = vrot.slane %v3360_v59, 6  ;;  %v1816_v42 = vrot.slane %v3360_v59, 2  ;;  %v1530_v36 = vmul.bf16 %v3350_v35, %v2898_v17  ;;  %v1578_v41 = vrot.slane %v3366_v20, 6 }
 0x2ee   : > { %v1539_v2 = vmul.bf16 %v3350_v35, %v2908_v48  ;;  %v1538_v17 = vmul.bf16 %v3347_v28, %v3817_v14  ;;  %v1548_v58 = vmul.bf16 %v3350_v35, %v2938_v3  ;;  %v1547_v48 = vmul.bf16 %v3347_v28, %v3818_v5  ;;  %v3819_v3 = vld [vmem:[#allocation19_spill] sm:$0xff] }
 0x2ef   : > { %1742 = vrot.lane.b32.xlu0 %v1731_v15, %s2382_s22  ;;  %v1621_v26 = vrot.slane %v1530_v36, 4  ;;  %v1557_v7 = vmul.bf16 %v3350_v35, %v2994_v55  ;;  %v1556_v34 = vmul.bf16 %v3347_v28, %v3819_v3  ;;  %v1815_v43 = vrot.slane %v3366_v20, 2 }
 0x2f0   : > { %1788 = vrot.lane.b32.xlu1 %v1776_v8, %s2372_s12  ;;  %v1665_v11 = vrot.slane %v1539_v2, 2  ;;  %v1664_v21 = vrot.slane %v1538_v17, 2  ;;  %v1735_v44 = vrot.slane %v1548_v58, 6  ;;  %v1734_v15 = vrot.slane %v1547_v48, 6 }
 0x2f1   : > { %v1779_v8 = vrot.slane %v1557_v7, 4  ;;  %v1531_v63 = vmul.bf16 %v3366_v20, %v3822_v54 }
 0x2f3   : > { %1786 = vrot.lane.b32.xlu0 %v1775_v27, %s2372_s12  ;;  %v3820_v27 = vld [vmem:[#allocation11_spill] sm:$0xff]  ;;  %v1622_v52 = vrot.slane %v1531_v63, 4 }
 0x2f4   : > { %1588 = vrot.lane.b32.xlu1 %v1575_v38, %s2377_s17  ;;  %v1532_v9 = vmul.bf16 %v3360_v59, %v3820_v27  ;;  %v1778_v38 = vrot.slane %v1556_v34, 4  ;;  %v3831_v34 = vld [vmem:[#allocation26_spill] sm:$0xff] }
 0x2f6   : > { %v1623_v55 = vrot.slane %v1532_v9, 4 }
 0x2f7   : > { %1674 = vrot.lane.b32.xlu0 %v1662_v4, %s2380_s20  ;;  %v3821_v4 = vld [vmem:[#allocation9_spill] sm:$0xff] }
 0x2f8   : > { %1825 = vrot.lane.b32.xlu1 %v1812_v60, %s2379_s19  ;;  %v1541_v60 = vmul.bf16 %v3360_v59, %v3821_v4 }
 0x2fa   : > { %v1667_v10 = vrot.slane %v1541_v60, 2 }
 0x2fb   : > { %1702 = vrot.lane.b32.xlu0 %v3329_v53, %s2378_s18 }
 0x2fc   : > { %1860 = vrot.lane.b32.xlu1 %v1564_v47, %s2383_s23 }
 0x2ff   : > { %1704 = vrot.lane.b32.xlu0 %v3347_v28, %s2378_s18 }
 0x300   : > { %1706 = vrot.lane.b32.xlu1 %v3350_v35, %s2378_s18 }
 0x303   : > { %1590 = vrot.lane.b32.xlu0 %v1576_v18, %s2377_s17 }
 0x304   : > { %1710 = vrot.lane.b32.xlu1 %v3360_v59, %s2378_s18 }
 0x307   : > { %1708 = vrot.lane.b32.xlu0 %v3366_v20, %s2378_s18 }
 0x308   : > { %1676 = vrot.lane.b32.xlu1 %v1663_v39, %s2380_s20  ;;  %v1550_v39 = vmul.bf16 %v3360_v59, %v3823_v0 }
 0x30a   : > { %v3407_v51 = vpop.permute.xlu1 %1694  ;;  %v1737_v6 = vrot.slane %v1550_v39, 6 }
 0x30b   : > { %1827 = vrot.lane.b32.xlu0 %v1813_v56, %s2379_s19 }
 0x30c   : > { %1592 = vrot.lane.b32.xlu1 %v1577_v45, %s2377_s17  ;;  %v3424_v47 = vpop.permute.xlu0 %1580  ;;  %v1540_v45 = vmul.bf16 %v3366_v20, %v3824_v32 }
 0x30e   : > { %v3418_v49 = vpop.permute.xlu1 %1696  ;;  %v1666_v57 = vrot.slane %v1540_v45, 2 }
 0x30f   : > { %1632 = vrot.lane.b32.xlu0 %v1619_v22, %s2381_s21 }
 0x310   : > { %1829 = vrot.lane.b32.xlu1 %v1814_v46, %s2379_s19  ;;  %v1559_v46 = vmul.bf16 %v3360_v59, %v3825_v19 }
 0x312   : > { %v3430_v18 = vpop.permute.xlu1 %1852  ;;  %v1781_v36 = vrot.slane %v1559_v46, 4 }
 0x313   : > { %1746 = vrot.lane.b32.xlu0 %v1733_v30, %s2382_s22 }
 0x314   : > { %1596 = vrot.lane.b32.xlu1 %v1579_v12, %s2377_s17  ;;  %v3826_v12 = vld [vmem:[#allocation23_spill] sm:$0xff] }
 0x317   : > { %1790 = vrot.lane.b32.xlu0 %v1777_v50, %s2372_s12  ;;  %v1549_v50 = vmul.bf16 %v3366_v20, %v3826_v12 }
 0x318   : > { %1833 = vrot.lane.b32.xlu1 %v1816_v42, %s2379_s19 }
 0x319   : > { %v1736_v25 = vrot.slane %v1549_v50, 6 }
 0x31b   : > { %1594 = vrot.lane.b32.xlu0 %v1578_v41, %s2377_s17 }
 0x31c   : > { %1636 = vrot.lane.b32.xlu1 %v1621_v26, %s2381_s21  ;;  %v1558_v26 = vmul.bf16 %v3366_v20, %v3827_v37 }
 0x31f   : > { %1634 = vrot.lane.b32.xlu0 %v1620_v33, %s2381_s21  ;;  %v3828_v33 = vld [vmem:[#allocation25_spill] sm:$0xff] }
 0x320   : > { %1680 = vrot.lane.b32.xlu1 %v1665_v11, %s2380_s20  ;;  %v1566_v14 = vmul.bf16 %v3350_v35, %v3828_v33  ;;  %v1780_v11 = vrot.slane %v1558_v26, 4 }
 0x323   : > { %1678 = vrot.lane.b32.xlu0 %v1664_v21, %s2380_s20  ;;  %v3829_v21 = vld [vmem:[#allocation17_spill] sm:$0xff] }
 0x324   : > { %1750 = vrot.lane.b32.xlu1 %v1735_v44, %s2382_s22  ;;  %v1568_v5 = vmul.bf16 %v3360_v59, %v3829_v21  ;;  %v3830_v44 = vld [vmem:[#allocation22_spill] sm:$0xff] }
 0x325   : > { %v1565_v7 = vmul.bf16 %v3347_v28, %v3830_v44  ;;  %v2008_v59 = vld [vmem:[%s3749_s5] sm:$0xf]  ;;  %v1712_v44 = vsel %vm973_vm10, %v3407_v51, %v3418_v49 }
 0x327   : > { %1748 = vrot.lane.b32.xlu0 %v1734_v15, %s2382_s22 }
 0x328   : > { %1794 = vrot.lane.b32.xlu1 %v1779_v8, %s2372_s12  ;;  %v1567_v8 = vmul.bf16 %v3366_v20, %v3831_v34 }
 0x32b   : > { %1792 = vrot.lane.b32.xlu0 %v1778_v38, %s2372_s12 }
 0x32c   : > { %1640 = vrot.lane.b32.xlu1 %v1623_v55, %s2381_s21  ;;  %v3832_v55 = vld [vmem:[#allocation3_spill] sm:$0xff] }
 0x32d   : > { %v1518_v4 = vmul.bf16 %v3250_v1, %v3832_v55 }
 0x32f   : > { %1831 = vrot.lane.b32.xlu0 %v1815_v43, %s2379_s19 }
 0x330   : > { %1684 = vrot.lane.b32.xlu1 %v1667_v10, %s2380_s20 }
 0x331   : > { %v3436_v56 = vpop.permute.xlu0 %1698 }
 0x332   : > { %v3440_v22 = vpop.permute.xlu1 %1700 }
 0x333   : > { %v3447_v30 = vsel %vm973_vm10, %v3436_v56, %v3440_v22  ;;  %1638 = vrot.lane.b32.xlu0 %v1622_v52, %s2381_s21 }
 0x334   : > { %1754 = vrot.lane.b32.xlu1 %v1737_v6, %s2382_s22  ;;  %v3833_v6 = vld [vmem:[#allocation4_spill] sm:$0xff] }
 0x335   : > { %v3451_v29 = vpop.permute.xlu0 %1817  ;;  %v1517_v19 = vmul.bf16 %v3242_v24, %v3833_v6 }
 0x336   : > { %v1585_v42 = vpop.permute.xlu1 %1584 }
 0x337   : > { %1682 = vrot.lane.b32.xlu0 %v1666_v57, %s2380_s20  ;;  %v3834_v57 = vld [vmem:[#allocation2_spill] sm:$0xff] }
 0x338   : > { %1798 = vrot.lane.b32.xlu1 %v1781_v36, %s2372_s12  ;;  %v1516_v12 = vmul.bf16 %v3235_v23, %v3834_v57 }
 0x339   : > { %v1583_v41 = vpop.permute.xlu0 %1582 }
 0x33a   : > { %v1625_v2 = vpop.permute.xlu1 %1624  ;;  %v1599_v1 = vsel %vm865_vm6, %v1583_v41, %v1585_v42  ;;  %v1598_v46 = vsel %vm865_vm6, %v3424_v47, %v1583_v41 }
 0x33b   : > { %1752 = vrot.lane.b32.xlu0 %v1736_v25, %s2382_s22  ;;  %v1883_v25 = vsel %vm396_vm0, %v1517_v19, %v1599_v1  ;;  %v1880_v24 = vsel %vm396_vm0, %v1516_v12, %v1598_v46 }
 0x33c   : > { %1864 = vrot.lane.b32.xlu1 %v1566_v14, %s2383_s23 }
 0x33d   : > { %v3463_v17 = vpop.permute.xlu0 %1819 }
 0x33e   : > { %v1783_v58 = vpop.permute.xlu1 %1782 }
 0x33f   : > { %1796 = vrot.lane.b32.xlu0 %v1780_v11, %s2372_s12  ;;  %s2329_s12 = sshll.u32 %s3837_s25, 5 }
 0x340   : > { %1868 = vrot.lane.b32.xlu1 %v1568_v5, %s2383_s23  ;;  %s3735_s15 = scalar_lea.vmem %s3751_s7, %s2329_s12 }
 0x341   : > { %v3469_v48 = vpop.permute.xlu0 %1854 }
 0x342   : > { %v1822_v15 = vpop.permute.xlu1 %1821 }
 0x343   : > { %1862 = vrot.lane.b32.xlu0 %v1565_v7, %s2383_s23 }
 0x345   : > { %v1669_v3 = vpop.permute.xlu0 %1668 }
 0x346   : > { %v3476_v27 = vpop.permute.xlu1 %1856 }
 0x347   : > { %1866 = vrot.lane.b32.xlu0 %v1567_v8, %s2383_s23  ;;  %v1713_v8 = vsel %vm973_vm10, %v3418_v49, %v3436_v56  ;;  %v1871_v19 = vsel %vm1116_vm13, %v3469_v48, %v3476_v27 }
 0x349   : > { %v1739_v9 = vpop.permute.xlu0 %1738 }
 0x34a   : > { %v1627_v38 = vpop.permute.xlu1 %1626 }
 0x34b   : > { %2011 = vperm.xlu0 %2355, %v2008_v59   ;;  %v1642_v50 = vsel %vm901_vm8, %v1625_v2, %v1627_v38 }
 0x34c   : > { %v1903_v41 = vsel %vm1125_vm7, %v1880_v24, %v1642_v50 }
 0x34d   : > { %v3484_v60 = vpop.permute.xlu0 %1586 }
 0x34e   : > { %v1600_v43 = vsel %vm865_vm6, %v1585_v42, %v3484_v60  ;;  %v1741_v54 = vpop.permute.xlu1 %1740 }
 0x34f   : > { %v3489_v63 = vsel %vm396_vm0, %v1518_v4, %v1600_v43  ;;  %v1756_v33 = vsel %vm1018_vm11, %v1739_v9, %v1741_v54  ;;  %v1836_v43 = vsel %vm1080_vm12, %v3463_v17, %v1822_v15 }
 0x350   : > { %v1945_v34 = vsel %vm396_vm0, %v1712_v44, %v1756_v33 }
 0x351   : > { %v1671_v10 = vpop.permute.xlu0 %1670 }
 0x352   : > { %v1785_v0 = vpop.permute.xlu1 %1784  ;;  %v1686_v37 = vsel %vm946_vm9, %v1669_v3, %v1671_v10 }
 0x353   : > { %v1920_v11 = vsel %vm1918_vm2, %v1903_v41, %v1686_v37  ;;  %v1800_v21 = vsel %vm761_vm1, %v1783_v58, %v1785_v0  ;;  %v3835_v41 = vld [vmem:[#allocation5_spill] sm:$0xff] }
 0x354   : > { %v1968_v58 = vsel %vm1125_vm7, %v1945_v34, %v1800_v21 }
 0x355   : > { %v3491_v39 = vpop.permute.xlu0 %1823 }
 0x356   : > { %v3493_v52 = vpop.permute.xlu1 %1672  ;;  %v1837_v49 = vsel %vm1080_vm12, %v1822_v15, %v3491_v39  ;;  %v1870_v15 = vsel %vm1116_vm13, %v3430_v18, %v3469_v48  ;;  %v3574_v18 = vld [vmem:[%s3748_s4] sm:$0x3] }
 0x357   : > { %v1687_v47 = vsel %vm946_vm9, %v1671_v10, %v3493_v52 }
 0x359   : > { %v3495_v32 = vpop.permute.xlu0 %1858 }
 0x35a   : > { %v3497_v45 = vpop.permute.xlu1 %1630 }
 0x35d   : > { %v3507_v36 = vpop.permute.xlu0 %1628 }
 0x35e   : > { %v1643_v42 = vsel %vm901_vm8, %v1627_v38, %v3507_v36  ;;  %v3513_v26 = vpop.permute.xlu1 %1744  ;;  %v1644_v33 = vsel %vm901_vm8, %v3507_v36, %v3497_v45 }
 0x35f   : > { %v1905_v23 = vsel %vm1125_vm7, %v1883_v25, %v1643_v42 }
 0x360   : > { %v1923_v2 = vsel %vm1918_vm2, %v1905_v23, %v1687_v47 }
 0x361   : > { %2042 = vmatprep.subr.bf16.mxu0 %v1923_v2  ;;  %v1743_v14 = vpop.permute.xlu0 %1742  ;;  %v1519_v2 = vmul.bf16 %v3256_v40, %v3835_v41  ;;  %v1907_v40 = vsel %vm1125_vm7, %v3489_v63, %v1644_v33 }
 0x362   : > { %v3524_v5 = vpop.permute.xlu1 %1788  ;;  %2043 = vmatpush1.bf16.msra.mxu0 %v1920_v11  ;;  %v1757_v7 = vsel %vm1018_vm11, %v1741_v54, %v1743_v14  ;;  %v1758_v3 = vsel %vm1018_vm11, %v1743_v14, %v3513_v26 }
 0x363   : > { %v1948_v9 = vsel %vm396_vm0, %v1713_v8, %v1757_v7  ;;  %v1951_v38 = vsel %vm396_vm0, %v3447_v30, %v1758_v3  ;;  %v1835_v30 = vsel %vm1080_vm12, %v3451_v29, %v3463_v17  ;;  %v2019_v29 = vsel %vm396_vm0, %v1870_v15, 0 }
 0x364   : > { %v1984_v6 = vsel %vm1918_vm2, %v1968_v58, %v1835_v30 }
 0x365   : > { %v1787_v59 = vpop.permute.xlu0 %1786 }
 0x366   : > { %v1801_v51 = vsel %vm761_vm1, %v1785_v0, %v1787_v59  ;;  %v1802_v55 = vsel %vm761_vm1, %v1787_v59, %v3524_v5  ;;  %v3543_v4 = vpop.permute.xlu1 %1588 }
 0x367   : > { %v1972_v56 = vsel %vm1125_vm7, %v1951_v38, %v1802_v55  ;;  %v1970_v54 = vsel %vm1125_vm7, %v1948_v9, %v1801_v51  ;;  %v1601_v23 = vsel %vm865_vm6, %v3484_v60, %v3543_v4 }
 0x368   : > { %v1987_v10 = vsel %vm1918_vm2, %v1970_v54, %v1836_v43  ;;  %v1990_v0 = vsel %vm1918_vm2, %v1972_v56, %v1837_v49  ;;  %v1889_v11 = vsel %vm396_vm0, %v1519_v2, %v1601_v23 }
 0x369   : > { %2044 = vmatprep.subr.bf16.mxu0 %v1987_v10  ;;  %v1675_v1 = vpop.permute.xlu0 %1674 }
 0x36a   : > { %v3563_v46 = vpop.permute.xlu1 %1825  ;;  %2045 = vmatpush1.bf16.msra.mxu0 %v1984_v6  ;;  %v1688_v21 = vsel %vm946_vm9, %v3493_v52, %v1675_v1 }
 0x36b   : > { %2319 = vmatprep.subr.msk.bf16.mxu0 %vm396_vm0, %v1871_v19  ;;  %v1926_v8 = vsel %vm1918_vm2, %v1907_v40, %v1688_v21  ;;  %v1838_v51 = vsel %vm1080_vm12, %v3491_v39, %v3563_v46 }
 0x36d   : > { %v3567_v17 = vpop.permute.xlu0 %1702 }
 0x36e   : > { %v3569_v57 = vpop.permute.xlu1 %1860  ;;  %2047 = vmatpush1.bf16.msra.mxu0 %v2019_v29 }
 0x371   : > { %2320 = vmatmul.mubr.msk.bf16.vlgmr.msra.gmra.mrb[8].mxu0 %vm2014_vm3, %v3574_v18  ;;  %v3578_v48 = vpop.permute.xlu0 %1704 }
 0x372   : > { %v3580_v12 = vpop.permute.xlu1 %1706  ;;  %2156 = vmatprep.mubr.bf16.mxu0 %v3810_v61 }
 0x375   : > { %v1591_v50 = vpop.permute.xlu0 %1590 }
 0x376   : > { %v3583_v25 = vpop.permute.xlu1 %1710  ;;  %v1602_v54 = vsel %vm865_vm6, %v3543_v4, %v1591_v50 }
 0x379   : > { %v3585_v37 = vpop.permute.xlu0 %1708 }
 0x37a   : > { %v1677_v42 = vpop.permute.xlu1 %1676 }
 0x37b   : > { %v1689_v60 = vsel %vm946_vm9, %v1675_v1, %v1677_v42 }
 0x37d   : > { %v3587_v24 = vpop.permute.xlu0 %1827 }
 0x37e   : > { %v3589_v47 = vpop.permute.xlu1 %1592  ;;  %v1839_v40 = vsel %vm1080_vm12, %v3563_v46, %v3587_v24 }
 0x37f   : > { %v1603_v30 = vsel %vm865_vm6, %v1591_v50, %v3589_v47 }
 0x381   : > { %v1633_v14 = vpop.permute.xlu0 %1632 }
 0x382   : > { %v1645_v44 = vsel %vm901_vm8, %v3497_v45, %v1633_v14  ;;  %v3604_v7 = vpop.permute.xlu1 %1829  ;;  %v1715_v45 = vsel %vm973_vm10, %v3440_v22, %v3567_v17  ;;  %v1872_v22 = vsel %vm1116_vm13, %v3476_v27, %v3495_v32  ;;  %v1520_v27 = vmul.bf16 %v3329_v53, %v2520_v62 }
 0x383   : > { %v1909_v3 = vsel %vm1125_vm7, %v1889_v11, %v1645_v44  ;;  %v2025_v39 = vsel %vm396_vm0, %v1872_v22, 0 }
 0x384   : > { %v1929_v36 = vsel %vm1918_vm2, %v1909_v3, %v1689_v60  ;;  %v1892_v6 = vsel %vm396_vm0, %v1520_v27, %v1602_v54 }
 0x385   : > { %2083 = vmatprep.subr.bf16.mxu1 %v1929_v36  ;;  %v1747_v34 = vpop.permute.xlu0 %1746 }
 0x386   : > { %v3612_v58 = vpop.permute.xlu1 %1596  ;;  %2084 = vmatpush1.bf16.msra.mxu1 %v1926_v8  ;;  %v1759_v52 = vsel %vm1018_vm11, %v3513_v26, %v1747_v34 }
 0x387   : > { %v1954_v9 = vsel %vm396_vm0, %v1715_v45, %v1759_v52 }
 0x389   : > { %v1791_v59 = vpop.permute.xlu0 %1790 }
 0x38a   : > { %v1803_v63 = vsel %vm761_vm1, %v3524_v5, %v1791_v59  ;;  %v3622_v38 = vpop.permute.xlu1 %1833  ;;  %v1873_v5 = vsel %vm1116_vm13, %v3495_v32, %v3569_v57  ;;  %v1521_v32 = vmul.bf16 %v3347_v28, %v2546_v13 }
 0x38b   : > { %v1974_v55 = vsel %vm1125_vm7, %v1954_v9, %v1803_v63  ;;  %v1523_v63 = vmul.bf16 %v3366_v20, %v2573_v31 }
 0x38c   : > { %v1993_v26 = vsel %vm1918_vm2, %v1974_v55, %v1838_v51  ;;  %v1895_v15 = vsel %vm396_vm0, %v1521_v32, %v1603_v30  ;;  %v1718_v30 = vsel %vm973_vm10, %v3580_v12, %v3585_v37 }
 0x38d   : > { %2085 = vmatprep.subr.bf16.mxu1 %v1993_v26  ;;  %v1595_v43 = vpop.permute.xlu0 %1594 }
 0x38e   : > { %v1637_v49 = vpop.permute.xlu1 %1636  ;;  %2086 = vmatpush1.bf16.msra.mxu1 %v1990_v0  ;;  %v1604_v46 = vsel %vm865_vm6, %v3589_v47, %v1595_v43  ;;  %v1605_v9 = vsel %vm865_vm6, %v1595_v43, %v3612_v58 }
 0x38f   : > { %2321 = vmatprep.subr.msk.bf16.mxu1 %vm396_vm0, %v1873_v5  ;;  %v1901_v5 = vsel %vm396_vm0, %v1523_v63, %v1605_v9 }
 0x391   : > { %v1635_v56 = vpop.permute.xlu0 %1634 }
 0x392   : > { %v1681_v10 = vpop.permute.xlu1 %1680  ;;  %2088 = vmatpush1.bf16.msra.mxu1 %v2025_v39  ;;  %v1646_v0 = vsel %vm901_vm8, %v1633_v14, %v1635_v56  ;;  %v1647_v1 = vsel %vm901_vm8, %v1635_v56, %v1637_v49 }
 0x393   : > { %v1911_v19 = vsel %vm1125_vm7, %v1892_v6, %v1646_v0  ;;  %v1913_v13 = vsel %vm1125_vm7, %v1895_v15, %v1647_v1 }
 0x395   : > { %2322 = vmatmul.mubr.msk.bf16.vlgmr.msra.gmra.mrb[8].mxu1 %vm2014_vm3, %v3574_v18  ;;  %v1679_v4 = vpop.permute.xlu0 %1678 }
 0x396   : > { %v1690_v29 = vsel %vm946_vm9, %v1677_v42, %v1679_v4  ;;  %v1691_v62 = vsel %vm946_vm9, %v1679_v4, %v1681_v10  ;;  %v1751_v53 = vpop.permute.xlu1 %1750  ;;  %2197 = vmatprep.mubr.bf16.mxu1 %v3810_v61  ;;  %v1716_v42 = vsel %vm973_vm10, %v3567_v17, %v3578_v48  ;;  %v1717_v61 = vsel %vm973_vm10, %v3578_v48, %v3580_v12 }
 0x397   : > { %v1935_v28 = vsel %vm1918_vm2, %v1913_v13, %v1691_v62  ;;  %v1932_v50 = vsel %vm1918_vm2, %v1911_v19, %v1690_v29  ;;  %v1840_v17 = vsel %vm1080_vm12, %v3587_v24, %v3604_v7  ;;  %v1522_v24 = vmul.bf16 %v3350_v35, %v2552_v16 }
 0x398   : > { %2124 = vmatprep.subr.bf16.mxu0 %v1935_v28 }
 0x399   : > { %2125 = vmatpush1.bf16.msra.mxu0 %v1932_v50  ;;  %v1749_v23 = vpop.permute.xlu0 %1748  ;;  %v1898_v22 = vsel %vm396_vm0, %v1522_v24, %v1604_v46 }
 0x39a   : > { %v1795_v41 = vpop.permute.xlu1 %1794  ;;  %v1760_v2 = vsel %vm1018_vm11, %v1747_v34, %v1749_v23  ;;  %v1761_v33 = vsel %vm1018_vm11, %v1749_v23, %v1751_v53 }
 0x39b   : > { %v1957_v11 = vsel %vm396_vm0, %v1716_v42, %v1760_v2  ;;  %v1960_v21 = vsel %vm396_vm0, %v1717_v61, %v1761_v33 }
 0x39d   : > { %v1793_v14 = vpop.permute.xlu0 %1792 }
 0x39e   : > { %v1804_v44 = vsel %vm761_vm1, %v1791_v59, %v1793_v14  ;;  %v1805_v60 = vsel %vm761_vm1, %v1793_v14, %v1795_v41  ;;  %v1641_v3 = vpop.permute.xlu1 %1640 }
 0x39f   : > { %v1976_v48 = vsel %vm1125_vm7, %v1957_v11, %v1804_v44  ;;  %v1978_v36 = vsel %vm1125_vm7, %v1960_v21, %v1805_v60 }
 0x3a0   : > { %v1999_v34 = vsel %vm1918_vm2, %v1978_v36, %v1840_v17  ;;  %v1996_v8 = vsel %vm1918_vm2, %v1976_v48, %v1839_v40 }
 0x3a1   : > { %2126 = vmatprep.subr.bf16.mxu0 %v1999_v34  ;;  %v1832_v52 = vpop.permute.xlu0 %1831 }
 0x3a2   : > { %v1685_v45 = vpop.permute.xlu1 %1684  ;;  %2127 = vmatpush1.bf16.msra.mxu0 %v1996_v8  ;;  %v1841_v15 = vsel %vm1080_vm12, %v3604_v7, %v1832_v52  ;;  %v1842_v4 = vsel %vm1080_vm12, %v1832_v52, %v3622_v38 }
 0x3a5   : > { %v1639_v59 = vpop.permute.xlu0 %1638 }
 0x3a6   : > { %v1648_v51 = vsel %vm901_vm8, %v1637_v49, %v1639_v59  ;;  %v1649_v55 = vsel %vm901_vm8, %v1639_v59, %v1641_v3  ;;  %v1755_v26 = vpop.permute.xlu1 %1754 }
 0x3a7   : > { %v1915_v47 = vsel %vm1125_vm7, %v1898_v22, %v1648_v51  ;;  %v1917_v16 = vsel %vm1125_vm7, %v1901_v5, %v1649_v55 }
 0x3a9   : > { %v1683_v39 = vpop.permute.xlu0 %1682 }
 0x3aa   : > { %v1692_v58 = vsel %vm946_vm9, %v1681_v10, %v1683_v39  ;;  %v1693_v43 = vsel %vm946_vm9, %v1683_v39, %v1685_v45  ;;  %v1799_v20 = vpop.permute.xlu1 %1798  ;;  %v1719_v10 = vsel %vm973_vm10, %v3585_v37, %v3583_v25 }
 0x3ab   : > { %v1941_v31 = vsel %vm1918_vm2, %v1917_v16, %v1693_v43  ;;  %v1938_v35 = vsel %vm1918_vm2, %v1915_v47, %v1692_v58 }
 0x3ac   : > { %2165 = vmatprep.subr.bf16.mxu1 %v1941_v31 }
 0x3ad   : > { %2166 = vmatpush1.bf16.msra.mxu1 %v1938_v35  ;;  %v1753_v49 = vpop.permute.xlu0 %1752 }
 0x3ae   : > { %v1762_v56 = vsel %vm1018_vm11, %v1751_v53, %v1753_v49  ;;  %v1763_v54 = vsel %vm1018_vm11, %v1753_v49, %v1755_v26  ;;  %v1865_v12 = vpop.permute.xlu1 %1864 }
 0x3af   : > { %v1963_v32 = vsel %vm396_vm0, %v1718_v30, %v1762_v56  ;;  %v1966_v0 = vsel %vm396_vm0, %v1719_v10, %v1763_v54 }
 0x3b1   : > { %v1797_v27 = vpop.permute.xlu0 %1796 }
 0x3b2   : > { %v1806_v1 = vsel %vm761_vm1, %v1795_v41, %v1797_v27  ;;  %v1807_v6 = vsel %vm761_vm1, %v1797_v27, %v1799_v20  ;;  %v1869_v38 = vpop.permute.xlu1 %1868 }
 0x3b3   : > { %v1980_v19 = vsel %vm1125_vm7, %v1963_v32, %v1806_v1  ;;  %v1982_v25 = vsel %vm1125_vm7, %v1966_v0, %v1807_v6 }
 0x3b4   : > { %v2005_v37 = vsel %vm1918_vm2, %v1982_v25, %v1842_v4  ;;  %v2002_v29 = vsel %vm1918_vm2, %v1980_v19, %v1841_v15 }
 0x3b5   : > { %2167 = vmatprep.subr.bf16.mxu1 %v2005_v37  ;;  %v1863_v62 = vpop.permute.xlu0 %1862 }
 0x3b6   : > { %v1874_v53 = vsel %vm1116_vm13, %v3569_v57, %v1863_v62  ;;  %v1875_v13 = vsel %vm1116_vm13, %v1863_v62, %v1865_v12  ;;  %2168 = vmatpush1.bf16.msra.mxu1 %v2002_v29 }
 0x3b7   : > { %v2031_v7 = vsel %vm396_vm0, %v1874_v53, 0  ;;  %2323 = vmatprep.subr.msk.bf16.mxu0 %vm396_vm0, %v1875_v13 }
 0x3b8   : > { %2129 = vmatpush1.bf16.msra.mxu0 %v2031_v7 }
 0x3b9   : > { %v1867_v28 = vpop.permute.xlu0 %1866 }
 0x3ba   : > { %v1876_v50 = vsel %vm1116_vm13, %v1865_v12, %v1867_v28  ;;  %v1877_v23 = vsel %vm1116_vm13, %v1867_v28, %v1869_v38 }
 0x3bb   : > { %v2037_v41 = vsel %vm396_vm0, %v1876_v50, 0  ;;  %2324 = vmatmul.mubr.msk.bf16.vlgmr.msra.gmra.mrb[12].mxu0 %vm2014_vm3, %v3574_v18  ;;  %2325 = vmatprep.subr.msk.bf16.mxu1 %vm396_vm0, %v1877_v23 }
 0x3bc   : > { %2170 = vmatpush1.bf16.msra.mxu1 %v2037_v41 }
 0x3bf   : > { %2326 = vmatmul.mubr.msk.bf16.vlgmr.msra.gmra.mrb[12].mxu1 %vm2014_vm3, %v3574_v18 }
 0x3ca   : > { %v2012_v57 = vpop.permute.xlu0 %2011 }
 0x444   : > { %v2076_v2 = vpop.f32.mrb[8].mxu0 }
 0x445   : > { %v2077_v33 = vadd.f32 %v2076_v2, %v2012_v57  ;;  %v2078_v42 = vpop.f32.mrb[9].mxu0 }
 0x446   : > { %v2079_v61 = vadd.f32 %v2078_v42, %v2012_v57  ;;  %v2080_v14 = vpop.f32.mrb[10].mxu0 }
 0x447   : > { %v2206_v11 = vmax.f32 %v2077_v33, 0.0  ;;  %v2081_v21 = vpop.f32.mrb[11].mxu0 }
 0x448   : > { %v2207_v44 = vmax.f32 %v2079_v61, 0.0 }
 0x44a   : > { %v2222_v60 = vcombine.low %v2206_v11, %v2207_v44 }
 0x44c   : > { %2230 = vst [vmem:[%s3735_s15] sm:$0xff] %v2222_v60 }
 0x468   : > { %v2117_v18 = vpop.f32.mrb[8].mxu1 }
 0x469   : > { %v2118_v3 = vadd.f32 %v2117_v18, %v2012_v57  ;;  %v2119_v40 = vpop.f32.mrb[9].mxu1 }
 0x46a   : > { %v2120_v17 = vadd.f32 %v2119_v40, %v2012_v57  ;;  %v2121_v48 = vpop.f32.mrb[10].mxu1 }
 0x46b   : > { %v2208_v36 = vmax.f32 %v2118_v3, 0.0  ;;  %v2122_v34 = vpop.f32.mrb[11].mxu1 }
 0x46c   : > { %v2209_v8 = vmax.f32 %v2120_v17, 0.0 }
 0x46e   : > { %v2223_v52 = vcombine.low %v2208_v36, %v2209_v8 }
 0x470   : > { %2231 = vst [vmem:[%s3735_s15 + $0x8] sm:$0xff] %v2223_v52 }
 0x48e   : > { %v2158_v45 = vpop.f32.mrb[12].mxu0 }
 0x48f   : > { %v2159_v59 = vadd.f32 %v2158_v45, %v2012_v57  ;;  %v2160_v46 = vpop.f32.mrb[13].mxu0 }
 0x490   : > { %v2161_v9 = vadd.f32 %v2160_v46, %v2012_v57  ;;  %v2162_v24 = vpop.f32.mrb[14].mxu0 }
 0x491   : > { %v2210_v63 = vmax.f32 %v2159_v59, 0.0  ;;  %v2163_v51 = vpop.f32.mrb[15].mxu0 }
 0x492   : > { %v2211_v55 = vmax.f32 %v2161_v9, 0.0  ;;  %v2199_v26 = vpop.f32.mrb[12].mxu1 }
 0x493   : > { %v2200_v22 = vadd.f32 %v2199_v26, %v2012_v57  ;;  %v2201_v5 = vpop.f32.mrb[13].mxu1 }
 0x494   : > { %v2224_v39 = vcombine.low %v2210_v63, %v2211_v55  ;;  %v2202_v47 = vadd.f32 %v2201_v5, %v2012_v57  ;;  %v2203_v58 = vpop.f32.mrb[14].mxu1 }
 0x495   : > { %v2212_v43 = vmax.f32 %v2200_v22, 0.0  ;;  %v2204_v16 = vpop.f32.mrb[15].mxu1 }
 0x496   : > { %2232 = vst [vmem:[%s3735_s15 + $0x10] sm:$0xff] %v2224_v39  ;;  %v2213_v31 = vmax.f32 %v2202_v47, 0.0 }
 0x498   : > { %v2225_v35 = vcombine.low %v2212_v43, %v2213_v31 }
 0x49a   : > { %2233 = vst [vmem:[%s3735_s15 + $0x18] sm:$0xff] %v2225_v35 }
 0x49b PF: > { %s17_s24 = sadd.s32 1, %s2368_s24  }
 0x49c   : > { %p14_p4 = scmp.ge.s32.totalorder %s17_s24, 4  }
 0x49e   :  { %16 = sbr.rel (!%p14_p4) target bundleno = 1 (0x1), region = 81 }

</bundles_post_ra>
